<compile_context>
chip_gen: v7x
topology: tpu7x:2x2x1
jax: 0.10.0
libtpu: 0.0.40
codegen_flags: <defaults>
</compile_context>

<pallas_src>
import jax
import jax.numpy as jnp
from jax.experimental import pallas as pl
from jax.experimental.pallas import tpu as pltpu

_LANES = 128
_SUBLANES = 8


def _attention_pool_kernel(z_ref, q_ref, o_ref):
    """z_ref: (bb, N_w, D); q_ref: (1, D); o_ref: (bb, D)."""
    z = z_ref[...].astype(jnp.float32)                              # (bb, N, D)
    q = q_ref[...].astype(jnp.float32)                              # (1, D)

    # scores[b, n] = <z[b, n, :], q>: elementwise mul (VPU) + lane reduce (XLU).
    scores = jnp.sum(z * q[None, :, :], axis=-1, keepdims=True)     # (bb, N, 1)

    # Numerically stable softmax over the window axis; normalization deferred.
    m = jnp.max(scores, axis=1, keepdims=True)                      # (bb, 1, 1)
    e = jnp.exp(scores - m)                                         # (bb, N, 1)
    denom = jnp.sum(e, axis=1)                                      # (bb, 1)

    # Unnormalized weighted pool (VPU mul + sublane reduce), one exact scale.
    pooled = jnp.sum(e * z, axis=1)                                 # (bb, D)
    o_ref[...] = (pooled / denom).astype(o_ref.dtype)


def _round_up(x: int, m: int) -> int:
    return ((x + m - 1) // m) * m


def _vmem_limit_bytes() -> int:
    """Per-chip scoped-VMEM limit for this kernel: min(capacity/2, 64 MiB)."""
    cap = 64 * 1024 * 1024  # conservative fallback = v7x physical VMEM
    try:
        info = pltpu.get_tpu_info()
        cap = int(getattr(info, "vmem_capacity_bytes", cap)) or cap
    except Exception:
        pass
    return min(cap // 2, 64 * 1024 * 1024)


def _pick_block_b(batch: int, n_w: int, dim: int, in_itemsize: int,
                  vmem_limit: int) -> int:
    """Windows per grid step, sized against the VMEM budget (bounded; no
    budget-unaware full-batch fallback)."""
    # Per-window VMEM footprint of one grid step, counting native (8, 128)
    # tile padding of the (N_w, dim) minor dims.
    rows = _round_up(n_w, _SUBLANES)
    lanes = _round_up(dim, _LANES)
    tile = rows * lanes
    per_window = (
        2 * tile * in_itemsize        # double-buffered z input block
        + 3 * tile * 4                # f32 temporaries (upcast, z*q, e*z)
        + 2 * rows * _LANES * 4       # scores / e ((N, 1) values, lane-padded)
        + 2 * lanes * 4               # output block (double-buffered)
    )
    budget = (vmem_limit * 3) // 4    # headroom for Mosaic internals
    bb = max(_SUBLANES, budget // per_window)
    if bb >= batch:
        return batch                  # whole batch fits the budget: one block
    # Sublane-align the output-block row count when tiling.
    return max(_SUBLANES, (bb // _SUBLANES) * _SUBLANES)


def attention_pool_batched(z: jax.Array, q: jax.Array, *, block_b=None):
    """z: (B, N_w, dim), q: (dim,) -> (B, dim). Independent pool per window."""
    B, n_w, dim = z.shape
    q2 = q.reshape(1, dim).astype(z.dtype)

    vmem_limit = _vmem_limit_bytes()
    itemsize = jnp.dtype(z.dtype).itemsize
    if block_b is None:
        bb = _pick_block_b(B, n_w, dim, itemsize, vmem_limit)
    else:
        bb = min(int(block_b), B)
    if bb < B and bb % _SUBLANES:
        bb = max(_SUBLANES, (bb // _SUBLANES) * _SUBLANES)

    grid = (pl.cdiv(B, bb),)

    in_bytes = B * n_w * dim * itemsize + dim * itemsize
    out_bytes = B * dim * itemsize
    cost = pl.CostEstimate(
        flops=4 * B * n_w * dim + 4 * B * n_w,
        transcendentals=B * n_w,
        bytes_accessed=in_bytes + out_bytes,
    )

    return pl.pallas_call(
        _attention_pool_kernel,
        out_shape=jax.ShapeDtypeStruct((B, dim), z.dtype),
        grid=grid,
        in_specs=[
            pl.BlockSpec((bb, n_w, dim), lambda i: (i, 0, 0)),
            pl.BlockSpec((1, dim), lambda i: (0, 0)),
        ],
        out_specs=pl.BlockSpec((bb, dim), lambda i: (i, 0)),
        compiler_params=pltpu.CompilerParams(
            # Window axis is embarrassingly parallel: shards across both
            # TensorCores on v7x; a plain sequential loop on v5e/v6e.
            dimension_semantics=("parallel",),
            vmem_limit_bytes=vmem_limit,
        ),
        cost_estimate=cost,
    )(z, q2)


def attention_pool(z: jax.Array, q: jax.Array) -> jax.Array:
    """Single-window forward matching the PyTorch module: (N_w, dim) -> (dim,)."""
    return attention_pool_batched(z[None], q)[0]


def attention_pool_ref(z: jax.Array, q: jax.Array) -> jax.Array:
    """Pure-JAX reference mirroring the PyTorch forward."""
    scores = z @ q                                   # (N_w,)
    alpha = jax.nn.softmax(scores, axis=0)[:, None]  # (N_w, 1)
    return jnp.sum(alpha * z, axis=0)


def attention_pool_batched_ref(z: jax.Array, q: jax.Array) -> jax.Array:
    return jax.vmap(lambda zi: attention_pool_ref(zi, q))(z)


if __name__ == "__main__":
    key = jax.random.PRNGKey(0)
    k_z, k_q = jax.random.split(key)

    B, n_w, dim = 32, 8, 64
    z = jax.random.normal(k_z, (B, n_w, dim), dtype=jnp.float32)
    # deterministic parameter init (module: q = nn.Parameter(torch.randn(dim)))
    q = jax.random.normal(k_q, (dim,), dtype=jnp.float32)

    # Batched path (budget-sized block; whole small batch fits in one block).
    out_b = attention_pool_batched(z, q)
    jax.block_until_ready(out_b)
    ref_b = attention_pool_batched_ref(z, q)
    assert out_b.shape == (B, dim)
    assert jnp.allclose(out_b, ref_b, atol=2e-5, rtol=2e-5), (
        f"max abs err {jnp.max(jnp.abs(out_b - ref_b))}"
    )

    # Explicit multi-step grid path (forces tiling + a ragged-free 8-window tile).
    out_t = attention_pool_batched(z, q, block_b=8)
    jax.block_until_ready(out_t)
    assert jnp.allclose(out_t, ref_b, atol=2e-5, rtol=2e-5), (
        f"max abs err {jnp.max(jnp.abs(out_t - ref_b))}"
    )

    # Single-window path (exact PyTorch module signature).
    out_1 = attention_pool(z[0], q)
    jax.block_until_ready(out_1)
    ref_1 = attention_pool_ref(z[0], q)
    assert out_1.shape == (dim,)
    assert jnp.allclose(out_1, ref_1, atol=2e-5, rtol=2e-5), (
        f"max abs err {jnp.max(jnp.abs(out_1 - ref_1))}"
    )

    print("KERNEL_OK")
</pallas_src>

<mosaic_0001>
module attributes {stable_mosaic.version = 11 : i64} {
  func.func @_attention_pool_kernel(%arg0: i32, %arg1: memref<32x8x64xf32, #tpu.memory_space<vmem>>, %arg2: memref<1x64xf32, #tpu.memory_space<vmem>>, %arg3: memref<32x64xf32, #tpu.memory_space<vmem>>) attributes {dimension_semantics = [#tpu.dimension_semantics<parallel>], iteration_bounds = array<i64: 1>, scalar_prefetch = 0 : i64, scratch_operands = 0 : i64, tpu.core_type = #tpu.core_type<tc>, window_params = [{transform_indices = @transform_0, window_bounds = array<i64: 32, 8, 64>}, {pipeline_mode = #tpu.pipeline_mode<synchronous>, transform_indices = @transform_1, window_bounds = array<i64: 1, 64>}, {transform_indices = @transform_2, window_bounds = array<i64: 32, 64>}]} {
    %c0 = arith.constant 0 : index
    %c0_0 = arith.constant 0 : index
    %c0_1 = arith.constant 0 : index
    %0 = vector.load %arg1[%c0, %c0_0, %c0_1] : memref<32x8x64xf32, #tpu.memory_space<vmem>>, vector<32x8x64xf32>
    %c0_2 = arith.constant 0 : index
    %c0_3 = arith.constant 0 : index
    %1 = vector.load %arg2[%c0_2, %c0_3] : memref<1x64xf32, #tpu.memory_space<vmem>>, vector<1x64xf32>
    %2 = vector.shape_cast %1 : vector<1x64xf32> to vector<1x1x64xf32>
    %3 = vector.broadcast %2 : vector<1x1x64xf32> to vector<32x8x64xf32>
    %4 = arith.mulf %0, %3 : vector<32x8x64xf32>
    %cst = arith.constant dense<0.000000e+00> : vector<32x8xf32>
    %5 = vector.multi_reduction <add>, %4, %cst [2] : vector<32x8x64xf32> to vector<32x8xf32>
    %6 = vector.shape_cast %5 : vector<32x8xf32> to vector<32x8x1xf32>
    %cst_4 = arith.constant dense<0xFF800000> : vector<32x1xf32>
    %7 = vector.multi_reduction <maximumf>, %6, %cst_4 [1] : vector<32x8x1xf32> to vector<32x1xf32>
    %8 = vector.shape_cast %7 : vector<32x1xf32> to vector<32x1x1xf32>
    %9 = vector.broadcast %8 : vector<32x1x1xf32> to vector<32x8x1xf32>
    %10 = arith.subf %6, %9 : vector<32x8x1xf32>
    %11 = math.exp %10 : vector<32x8x1xf32>
    %cst_5 = arith.constant dense<0.000000e+00> : vector<32x1xf32>
    %12 = vector.multi_reduction <add>, %11, %cst_5 [1] : vector<32x8x1xf32> to vector<32x1xf32>
    %13 = vector.broadcast %11 : vector<32x8x1xf32> to vector<32x8x64xf32>
    %14 = arith.mulf %13, %0 : vector<32x8x64xf32>
    %cst_6 = arith.constant dense<0.000000e+00> : vector<32x64xf32>
    %15 = vector.multi_reduction <add>, %14, %cst_6 [1] : vector<32x8x64xf32> to vector<32x64xf32>
    %16 = vector.broadcast %12 : vector<32x1xf32> to vector<32x64xf32>
    %17 = arith.divf %15, %16 : vector<32x64xf32>
    %c0_7 = arith.constant 0 : index
    %c0_8 = arith.constant 0 : index
    %18 = vector.load %arg3[%c0_7, %c0_8] : memref<32x64xf32, #tpu.memory_space<vmem>>, vector<32x64xf32>
    tpu.vector_store %arg3[%c0_7, %c0_8], %17 {strides = array<i32>} : memref<32x64xf32, #tpu.memory_space<vmem>>, vector<32x64xf32>,
    return
  }
  func.func @transform_0(%arg0: i32) -> (i32, i32, i32) {
    %c0_i32 = arith.constant 0 : i32
    %c0_i32_0 = arith.constant 0 : i32
    %c0_i32_1 = arith.constant 0 : i32
    return %arg0, %c0_i32, %c0_i32_0 : i32, i32, i32
  }
  func.func @transform_1(%arg0: i32) -> (i32, i32) {
    %c0_i32 = arith.constant 0 : i32
    %c0_i32_0 = arith.constant 0 : i32
    %c0_i32_1 = arith.constant 0 : i32
    return %c0_i32, %c0_i32_0 : i32, i32
  }
  func.func @transform_2(%arg0: i32) -> (i32, i32) {
    %c0_i32 = arith.constant 0 : i32
    %c0_i32_0 = arith.constant 0 : i32
    return %arg0, %c0_i32 : i32, i32
  }
}

</mosaic_0001>

<bundles_post_ra>
// kernel: tpu_custom_call.1
= control target key start
LH: loop header
LB: loop body
LE: loop exit
PB: predicated region body
PF: predicated region fallthrough
CT: control target
= control target key end

     0   :  { %7 = vsyncpa [#allocation3], 0  ;;  %s2058_s0 = inlined_call_operand.hbm [shape: f32[32,8,64], index: 0, kind: input, shape index: {}]   ;;  %s2059_s1 = inlined_call_operand.vmem [shape: f32[1,64], index: 1, kind: input, shape index: {}]   ;;  %s2060_s2 = inlined_call_operand.hbm [shape: f32[32,64], index: 2, kind: output, shape index: {}]  }
   0x1   :  { %8 = vsyncpa [#allocation4], 0  ;;  %s1282_s9 = smov [#allocation2]   ;;  %s1234_s13 = scalar_lea.hbm %s2058_s0, 4096 }
   0x2   :  { %s14_s10 = sshll.u32 %s1282_s9, 4  ;;  %p1235_p0 = scmp.ne.s32.totalorder %s2058_s0, %s1234_s13  ;;  %s15_s10 = int_to_ptr.vmem [resolvable:$true] %s14_s10 }
   0x3   :  { %p1238_p1 = scmp.lt.u32.totalorder %s1234_s13, %s2058_s0 }
   0x5   :  { %p1240_p2 = pnand %p1238_p1, %p1235_p0 }
   0x7   :  { %1243 = shalt.err (!%p1240_p2)
}
   0x8   :  { %s1244_s18 = scalar_lea.vmem %s15_s10, 4096  ;;  %p1249_p4 = scmp.lt.s32.totalorder %s15_s10, %s15_s10 }
   0x9   :  { %p1245_p3 = scmp.ne.s32.totalorder %s15_s10, %s1244_s18  ;;  %p1250_p5 = scmp.lt.s32.totalorder %s1244_s18, %s1244_s18 }
   0xb   :  { %p1251_p6 = por %p1250_p5, %p1249_p4 }
   0xd   :  { %p1252_p7 = pnand %p1251_p6, %p1245_p3 }
   0xf   :  { %1255 = shalt.err (!%p1252_p7)
}
  0x10   :  { %s1283_s19 = smov 128   ;;  %s1284_s20 = smov 8  }
  0x11   :  { %20 = dma.hbm_to_vmem [thread:$0]  %s2058_s0, 4096, %s15_s10, [#allocation3], %s1283_s19, %s1283_s19, %s1284_s20  }
  0x12   :  { %1278 = dma.done.wait [#allocation3], 4096  }
  0x13   :  { %1279 = vsyncadd [#allocation3], 4294963200  ;;  %v1316_v0 = vld [vmem:[#allocation2 + $0x40] sm:$0xff]  ;;  %vm97_vm0 = vcmask 523264   ;;  %v1329_v5 = vld [vmem:[#allocation2 + $0x48] sm:$0xff]  ;;  %vm1026_vm1 = vcmask 1041409  }
  0x14   :  { %v1321_v1 = vld [vmem:[%s2059_s1] ss:$0 sm:$0xff]  ;;  %v1331_v6 = vld [vmem:[#allocation2 + $0x8] sm:$0xff]  ;;  %v1359_v23 = vld [vmem:[#allocation2 + $0x50] sm:$0xff]  ;;  %vm1028_vm2 = vcmask 1042434   ;;  %vm1030_vm3 = vcmask 1043459  }
  0x15   :  { %v1323_v2 = vld [vmem:[#allocation2] sm:$0xff]  ;;  %v73_v3 = vmul.f32 %v1321_v1, %v1316_v0  ;;  %v74_v7 = vmul.f32 %v1321_v1, %v1329_v5  ;;  %v66_v8 = vmul.f32 %v1321_v1, %v1331_v6  ;;  %v1337_v9 = vld [vmem:[#allocation2 + $0x88] sm:$0xff]  ;;  %v1361_v24 = vld [vmem:[#allocation2 + $0x10] sm:$0xff]  ;;  %v75_v27 = vmul.f32 %v1321_v1, %v1359_v23  ;;  %s1285_s0 = smov [#allocation5]  }
  0x16   :  { %v65_v4 = vmul.f32 %v1321_v1, %v1323_v2  ;;  %v1339_v10 = vld [vmem:[#allocation2 + $0x80] sm:$0xff]  ;;  %v82_v15 = vmul.f32 %v1321_v1, %v1337_v9  ;;  %v1349_v17 = vld [vmem:[#allocation2 + $0xc8] sm:$0xff]  ;;  %v67_v28 = vmul.f32 %v1321_v1, %v1361_v24  ;;  %v1369_v29 = vld [vmem:[#allocation2 + $0xd0] sm:$0xff]  ;;  %vm1032_vm4 = vcmask 1044484   ;;  %s1074_s1 = sshll.u32 %s1285_s0, 4  ;;  %s1075_s1 = int_to_ptr.vmem [resolvable:$true] %s1074_s1 }
  0x17   :  { %v122_v11 = vsel %vm97_vm0, %v73_v3, 0.0  ;;  %v125_v13 = vsel %vm97_vm0, %v74_v7, 0.0  ;;  %v101_v14 = vsel %vm97_vm0, %v66_v8, 0.0  ;;  %v81_v16 = vmul.f32 %v1321_v1, %v1339_v10  ;;  %v1351_v18 = vld [vmem:[#allocation2 + $0xc0] sm:$0xff]  ;;  %v1371_v30 = vld [vmem:[#allocation2 + $0x90] sm:$0xff]  ;;  %v1379_v35 = vld [vmem:[#allocation2 + $0x58] sm:$0xff]  ;;  %p1261_p9 = scmp.lt.s32.totalorder %s1075_s1, %s1075_s1 }
  0x18   :  { %v98_v12 = vsel %vm97_vm0, %v65_v4, 0.0  ;;  %123 = vadd.xlane.f32.xlu1 %v122_v11  ;;  %v149_v19 = vsel %vm97_vm0, %v82_v15, 0.0  ;;  %v90_v21 = vmul.f32 %v1321_v1, %v1349_v17  ;;  %v89_v22 = vmul.f32 %v1321_v1, %v1351_v18  ;;  %v1381_v36 = vld [vmem:[#allocation2 + $0x18] sm:$0xff]  ;;  %v1399_v47 = vld [vmem:[#allocation2 + $0x60] sm:$0xff]  ;;  %v39_v59 = vld [vmem:[#allocation2 + $0x68] sm:$0xff]  ;;  %s1256_s25 = scalar_lea.vmem %s1075_s1, 512 }
  0x19   :  { %99 = vadd.xlane.f32.xlu0 %v98_v12  ;;  %v146_v20 = vsel %vm97_vm0, %v81_v16, 0.0  ;;  %v128_v31 = vsel %vm97_vm0, %v75_v27, 0.0  ;;  %v104_v32 = vsel %vm97_vm0, %v67_v28, 0.0  ;;  %v91_v33 = vmul.f32 %v1321_v1, %v1369_v29  ;;  %v1389_v41 = vld [vmem:[#allocation2 + $0xd8] sm:$0xff]  ;;  %v30_v48 = vld [vmem:[#allocation2 + $0x20] sm:$0xff]  ;;  %v31_v60 = vld [vmem:[#allocation2 + $0x28] sm:$0xff]  ;;  %p1257_p8 = scmp.ne.s32.totalorder %s1075_s1, %s1256_s25  ;;  %p1262_p10 = scmp.lt.s32.totalorder %s1256_s25, %s1256_s25 }
  0x1a   :  { %v173_v25 = vsel %vm97_vm0, %v90_v21, 0.0  ;;  %v170_v26 = vsel %vm97_vm0, %v89_v22, 0.0  ;;  %v83_v34 = vmul.f32 %v1321_v1, %v1371_v30  ;;  %v76_v39 = vmul.f32 %v1321_v1, %v1379_v35  ;;  %v1391_v42 = vld [vmem:[#allocation2 + $0x98] sm:$0xff]  ;;  %v54_v53 = vld [vmem:[#allocation2 + $0xe0] sm:$0xff]  ;;  %v55_v4 = vld [vmem:[#allocation2 + $0xe8] sm:$0xff] }
  0x1b   :  { %v176_v37 = vsel %vm97_vm0, %v91_v33, 0.0  ;;  %v68_v40 = vmul.f32 %v1321_v1, %v1381_v36  ;;  %v92_v45 = vmul.f32 %v1321_v1, %v1389_v41  ;;  %v84_v46 = vmul.f32 %v1321_v1, %v1391_v42  ;;  %v46_v54 = vld [vmem:[#allocation2 + $0xa0] sm:$0xff]  ;;  %v47_v7 = vld [vmem:[#allocation2 + $0xa8] sm:$0xff]  ;;  %v32_v15 = vld [vmem:[#allocation2 + $0x30] sm:$0xff]  ;;  %p1263_p11 = por %p1262_p10, %p1261_p9 }
  0x1c   :  { %126 = vadd.xlane.f32.xlu1 %v125_v13  ;;  %v152_v38 = vsel %vm97_vm0, %v83_v34, 0.0  ;;  %v131_v43 = vsel %vm97_vm0, %v76_v39, 0.0  ;;  %v77_v51 = vmul.f32 %v1321_v1, %v1399_v47  ;;  %v69_v52 = vmul.f32 %v1321_v1, %v30_v48  ;;  %v56_v22 = vld [vmem:[#allocation2 + $0xf0] sm:$0xff]  ;;  %v33_v33 = vld [vmem:[#allocation2 + $0x38] sm:$0xff] }
  0x1d   :  { %102 = vadd.xlane.f32.xlu0 %v101_v14  ;;  %v107_v44 = vsel %vm97_vm0, %v68_v40, 0.0  ;;  %v179_v49 = vsel %vm97_vm0, %v92_v45, 0.0  ;;  %v155_v50 = vsel %vm97_vm0, %v84_v46, 0.0  ;;  %v93_v57 = vmul.f32 %v1321_v1, %v54_v53  ;;  %v40_v14 = vld [vmem:[#allocation2 + $0x70] sm:$0xff]  ;;  %v57_v40 = vld [vmem:[#allocation2 + $0xf8] sm:$0xff]  ;;  %p1264_p12 = pnand %p1263_p11, %p1257_p8 }
  0x1e   :  { %v134_v55 = vsel %vm97_vm0, %v77_v51, 0.0  ;;  %v110_v56 = vsel %vm97_vm0, %v69_v52, 0.0  ;;  %v85_v58 = vmul.f32 %v1321_v1, %v46_v54  ;;  %v78_v63 = vmul.f32 %v1321_v1, %v39_v59 }
  0x1f   :  { %v182_v61 = vsel %vm97_vm0, %v93_v57, 0.0  ;;  %v70_v3 = vmul.f32 %v1321_v1, %v31_v60  ;;  %v94_v12 = vmul.f32 %v1321_v1, %v55_v4  ;;  %v86_v13 = vmul.f32 %v1321_v1, %v47_v7 }
  0x20   :  { %150 = vadd.xlane.f32.xlu1 %v149_v19  ;;  %v158_v62 = vsel %vm97_vm0, %v85_v58, 0.0  ;;  %v137_v8 = vsel %vm97_vm0, %v78_v63, 0.0  ;;  %v71_v21 = vmul.f32 %v1321_v1, %v32_v15  ;;  %v95_v28 = vmul.f32 %v1321_v1, %v56_v22 }
  0x21   :  { %147 = vadd.xlane.f32.xlu0 %v146_v20  ;;  %v113_v11 = vsel %vm97_vm0, %v70_v3, 0.0  ;;  %v185_v16 = vsel %vm97_vm0, %v94_v12, 0.0  ;;  %v161_v19 = vsel %vm97_vm0, %v86_v13, 0.0  ;;  %v79_v20 = vmul.f32 %v1321_v1, %v40_v14 }
  0x22   :  { %v116_v27 = vsel %vm97_vm0, %v71_v21, 0.0  ;;  %v188_v34 = vsel %vm97_vm0, %v95_v28, 0.0  ;;  %v72_v39 = vmul.f32 %v1321_v1, %v33_v33  ;;  %v96_v46 = vmul.f32 %v1321_v1, %v57_v40 }
  0x23   :  { %vm1034_vm5 = vcmask 1045509   ;;  %vm1036_vm6 = vcmask 1046534   ;;  %vm1038_vm7 = vcmask 1047559  }
  0x24   :  { %174 = vadd.xlane.f32.xlu1 %v173_v25  ;;  %v48_v25 = vld [vmem:[#allocation2 + $0xb0] sm:$0xff]  ;;  %v119_v45 = vsel %vm97_vm0, %v72_v39, 0.0 }
  0x25   :  { %171 = vadd.xlane.f32.xlu0 %v170_v26  ;;  %v140_v26 = vsel %vm97_vm0, %v79_v20, 0.0 }
  0x28   :  { %129 = vadd.xlane.f32.xlu1 %v128_v31  ;;  %v87_v31 = vmul.f32 %v1321_v1, %v48_v25 }
  0x29   :  { %105 = vadd.xlane.f32.xlu0 %v104_v32  ;;  %v41_v32 = vld [vmem:[#allocation2 + $0x78] sm:$0xff] }
  0x2c   :  { %177 = vadd.xlane.f32.xlu1 %v176_v37  ;;  %v164_v37 = vsel %vm97_vm0, %v87_v31, 0.0 }
  0x2d   :  { %153 = vadd.xlane.f32.xlu0 %v152_v38  ;;  %v80_v38 = vmul.f32 %v1321_v1, %v41_v32 }
  0x30   :  { %132 = vadd.xlane.f32.xlu1 %v131_v43  ;;  %v49_v43 = vld [vmem:[#allocation2 + $0xb8] sm:$0xff] }
  0x31   :  { %108 = vadd.xlane.f32.xlu0 %v107_v44  ;;  %v143_v44 = vsel %vm97_vm0, %v80_v38, 0.0  ;;  %v88_v48 = vmul.f32 %v1321_v1, %v49_v43 }
  0x34   :  { %180 = vadd.xlane.f32.xlu1 %v179_v49  ;;  %v191_v49 = vsel %vm97_vm0, %v96_v46, 0.0 }
  0x35   :  { %156 = vadd.xlane.f32.xlu0 %v155_v50  ;;  %v167_v50 = vsel %vm97_vm0, %v88_v48, 0.0 }
  0x38   :  { %135 = vadd.xlane.f32.xlu1 %v134_v55 }
  0x39   :  { %111 = vadd.xlane.f32.xlu0 %v110_v56 }
  0x3c   :  { %183 = vadd.xlane.f32.xlu1 %v182_v61 }
  0x3d   :  { %159 = vadd.xlane.f32.xlu0 %v158_v62 }
  0x40   :  { %138 = vadd.xlane.f32.xlu1 %v137_v8 }
  0x41   :  { %114 = vadd.xlane.f32.xlu0 %v113_v11 }
  0x44   :  { %186 = vadd.xlane.f32.xlu1 %v185_v16 }
  0x45   :  { %162 = vadd.xlane.f32.xlu0 %v161_v19 }
  0x48   :  { %141 = vadd.xlane.f32.xlu1 %v140_v26 }
  0x49   :  { %117 = vadd.xlane.f32.xlu0 %v116_v27 }
  0x4c   :  { %189 = vadd.xlane.f32.xlu1 %v188_v34 }
  0x4d   :  { %165 = vadd.xlane.f32.xlu0 %v164_v37 }
  0x50   :  { %144 = vadd.xlane.f32.xlu1 %v143_v44 }
  0x51   :  { %120 = vadd.xlane.f32.xlu0 %v119_v45 }
  0x54   :  { %192 = vadd.xlane.f32.xlu1 %v191_v49 }
  0x55   :  { %168 = vadd.xlane.f32.xlu0 %v167_v50 }
  0xa5   :  { %v124_v51 = vpop.xlane.xlu1 %123 }
  0xa6   :  { %v100_v52 = vpop.xlane.xlu0 %99  ;;  %v242_v53 = vrot.slane %v124_v51, 4 }
  0xa7   :  { %v194_v54 = vrot.slane %v100_v52, 4 }
  0xa8   :  { %v243_v55 = vmax.f32 %v124_v51, %v242_v53 }
  0xa9   :  { %v195_v56 = vmax.f32 %v100_v52, %v194_v54  ;;  %v127_v57 = vpop.xlane.xlu1 %126 }
  0xaa   :  { %v103_v58 = vpop.xlane.xlu0 %102  ;;  %v244_v59 = vrot.slane %v243_v55, 2  ;;  %v248_v61 = vrot.slane %v127_v57, 4 }
  0xab   :  { %v196_v60 = vrot.slane %v195_v56, 2  ;;  %v200_v1 = vrot.slane %v103_v58, 4 }
  0xac   :  { %v245_v62 = vmax.f32 %v243_v55, %v244_v59  ;;  %v249_v3 = vmax.f32 %v127_v57, %v248_v61 }
  0xad   :  { %v197_v63 = vmax.f32 %v195_v56, %v196_v60  ;;  %v201_v4 = vmax.f32 %v103_v58, %v200_v1  ;;  %v151_v7 = vpop.xlane.xlu1 %150 }
  0xae   :  { %v1436_v8 = vpop.xlane.xlu0 %147  ;;  %v246_v11 = vrot.slane %v245_v62, 1  ;;  %v250_v13 = vrot.slane %v249_v3, 2  ;;  %v296_v15 = vrot.slane %v151_v7, 4 }
  0xaf   :  { %v198_v12 = vrot.slane %v197_v63, 1  ;;  %v202_v14 = vrot.slane %v201_v4, 2  ;;  %v290_v16 = vrot.slane %v1436_v8, 4 }
  0xb0   :  { %v247_v19 = vmax.f32 %v245_v62, %v246_v11  ;;  %v251_v21 = vmax.f32 %v249_v3, %v250_v13  ;;  %v297_v25 = vmax.f32 %v151_v7, %v296_v15 }
  0xb1   :  { %v199_v20 = vmax.f32 %v197_v63, %v198_v12  ;;  %v203_v22 = vmax.f32 %v201_v4, %v202_v14  ;;  %v291_v26 = vmax.f32 %v1436_v8, %v290_v16  ;;  %v175_v27 = vpop.xlane.xlu1 %174 }
  0xb2   :  { %v1440_v28 = vpop.xlane.xlu0 %171  ;;  %v394_v31 = vsub.f32 %v124_v51, %v247_v19  ;;  %v252_v33 = vrot.slane %v251_v21, 1  ;;  %v298_v37 = vrot.slane %v297_v25, 2  ;;  %v344_v39 = vrot.slane %v175_v27, 4 }
  0xb3   :  { %v386_v32 = vsub.f32 %v100_v52, %v199_v20  ;;  %v204_v34 = vrot.slane %v203_v22, 1  ;;  %v292_v38 = vrot.slane %v291_v26, 2  ;;  %v338_v40 = vrot.slane %v1440_v28, 4 }
  0xb4   :  { %v434_v43 = vmul.f32 1.442695, %v394_v31  ;;  %v253_v45 = vmax.f32 %v251_v21, %v252_v33  ;;  %v299_v48 = vmax.f32 %v297_v25, %v298_v37  ;;  %v345_v50 = vmax.f32 %v175_v27, %v344_v39 }
  0xb5   :  { %v418_v44 = vmul.f32 1.442695, %v386_v32  ;;  %v205_v46 = vmax.f32 %v203_v22, %v204_v34  ;;  %v293_v49 = vmax.f32 %v291_v26, %v292_v38  ;;  %v339_v53 = vmax.f32 %v1440_v28, %v338_v40  ;;  %v1444_v54 = vpop.xlane.xlu1 %129 }
  0xb6   :  { %1091 = vpow2.f32 %v434_v43  ;;  %v395_v51 = vsub.f32 %v127_v57, %v253_v45  ;;  %v254_v55 = vrot.slane %v1444_v54, 4  ;;  %v300_v56 = vrot.slane %v299_v48, 1  ;;  %v1447_v61 = vpop.xlane.xlu0 %105 }
  0xb7   :  { %v387_v52 = vsub.f32 %v103_v58, %v205_v46  ;;  %1093 = vpow2.f32 %v418_v44  ;;  %v294_v59 = vrot.slane %v293_v49, 1  ;;  %v346_v60 = vrot.slane %v345_v50, 2 }
  0xb8   :  { %v436_v1 = vmul.f32 1.442695, %v395_v51  ;;  %v340_v63 = vrot.slane %v339_v53, 2  ;;  %v255_v3 = vmax.f32 %v1444_v54, %v254_v55  ;;  %v301_v4 = vmax.f32 %v299_v48, %v300_v56 }
  0xb9   :  { %v420_v62 = vmul.f32 1.442695, %v387_v52  ;;  %v295_v11 = vmax.f32 %v293_v49, %v294_v59  ;;  %v347_v12 = vmax.f32 %v345_v50, %v346_v60  ;;  %v1450_v13 = vpop.xlane.xlu1 %177  ;;  %v206_v20 = vrot.slane %v1447_v61, 4 }
  0xba   :  { %1095 = vpow2.f32 %v436_v1  ;;  %v341_v57 = vmax.f32 %v339_v53, %v340_v63  ;;  %v256_v58 = vrot.slane %v255_v3, 2  ;;  %v403_v14 = vsub.f32 %v151_v7, %v301_v4  ;;  %v1455_v31 = vpop.xlane.xlu0 %153 }
  0xbb   :  { %1097 = vpow2.f32 %v420_v62  ;;  %v402_v15 = vsub.f32 %v1436_v8, %v295_v11  ;;  %v348_v16 = vrot.slane %v347_v12, 1  ;;  %v350_v21 = vrot.slane %v1450_v13, 4 }
  0xbc   :  { %v342_v19 = vrot.slane %v341_v57, 1  ;;  %v452_v22 = vmul.f32 1.442695, %v403_v14  ;;  %v257_v26 = vmax.f32 %v255_v3, %v256_v58  ;;  %v207_v8 = vmax.f32 %v1447_v61, %v206_v20 }
  0xbd   :  { %v349_v25 = vmax.f32 %v347_v12, %v348_v16  ;;  %v450_v32 = vmul.f32 1.442695, %v402_v15  ;;  %v351_v38 = vmax.f32 %v1450_v13, %v350_v21  ;;  %v302_v39 = vrot.slane %v1455_v31, 4 }
  0xbe   :  { %v343_v33 = vmax.f32 %v341_v57, %v342_v19  ;;  %1099 = vpow2.f32 %v452_v22  ;;  %v258_v45 = vrot.slane %v257_v26, 1  ;;  %v208_v51 = vrot.slane %v207_v8, 2 }
  0xbf   :  { %v411_v34 = vsub.f32 %v175_v27, %v349_v25  ;;  %1101 = vpow2.f32 %v450_v32  ;;  %v352_v52 = vrot.slane %v351_v38, 2  ;;  %v1464_v55 = vmax.f32 %v1455_v31, %v302_v39 }
  0xc0   :  { %v1092_v37 = vpop.eup %1091  ;;  %v410_v7 = vsub.f32 %v1440_v28, %v343_v33 }
  0xc1   :  { %v1094_v40 = vpop.eup %1093  ;;  %v530_v43 = vrot.slane %v1092_v37, 4  ;;  %v468_v44 = vmul.f32 1.442695, %v411_v34  ;;  %v682_v46 = vmul.f32 %v1092_v37, %v1316_v0  ;;  %v1467_v0 = vmax.f32 %v257_v26, %v258_v45 }
  0xc2   :  { %v482_v48 = vrot.slane %v1094_v40, 4  ;;  %v466_v49 = vmul.f32 1.442695, %v410_v7  ;;  %v674_v27 = vmul.f32 %v1094_v40, %v1323_v2  ;;  %v1470_v2 = vpop.xlane.xlu1 %132  ;;  %v1478_v33 = vmax.f32 %v351_v38, %v352_v52 }
  0xc3   :  { %v531_v50 = vadd.f32 %v1092_v37, %v530_v43  ;;  %1103 = vpow2.f32 %v468_v44  ;;  %v762_v62 = vsel %vm97_vm0, %v682_v46, 0.0  ;;  %v260_v22 = vrot.slane %v1470_v2, 4 }
  0xc4   :  { %v1096_v28 = vpop.eup %1095  ;;  %v483_v53 = vadd.f32 %v1094_v40, %v482_v48  ;;  %1105 = vpow2.f32 %v466_v49  ;;  %v706_v11 = vsel %vm97_vm0, %v674_v27, 0.0  ;;  %v763_v20 = vrot.slane %v762_v62, 4 }
  0xc5   :  { %v1098_v56 = vpop.eup %1097  ;;  %v532_v59 = vrot.slane %v531_v50, 2  ;;  %v536_v60 = vrot.slane %v1096_v28, 4  ;;  %v683_v1 = vmul.f32 %v1096_v28, %v1329_v5  ;;  %v1475_v5 = vmax.f32 %v207_v8, %v208_v51 }
  0xc6   :  { %v484_v63 = vrot.slane %v483_v53, 2  ;;  %v488_v3 = vrot.slane %v1098_v56, 4  ;;  %v675_v15 = vmul.f32 %v1098_v56, %v1331_v6  ;;  %v707_v25 = vrot.slane %v706_v11, 4 }
  0xc7   :  { %v533_v4 = vadd.f32 %v532_v59, %v531_v50  ;;  %v537_v12 = vadd.f32 %v1096_v28, %v536_v60  ;;  %v769_v57 = vsel %vm97_vm0, %v683_v1, 0.0  ;;  %v396_v6 = vsub.f32 %v1444_v54, %v1467_v0 }
  0xc8   :  { %v485_v58 = vadd.f32 %v484_v63, %v483_v53  ;;  %v489_v14 = vadd.f32 %v1098_v56, %v488_v3  ;;  %v1100_v16 = vpop.eup %1099  ;;  %v770_v26 = vrot.slane %v769_v57, 4  ;;  %v713_v43 = vsel %vm97_vm0, %v675_v15, 0.0 }
  0xc9   :  { %v534_v19 = vrot.slane %v533_v4, 1  ;;  %v538_v21 = vrot.slane %v537_v12, 2  ;;  %v584_v37 = vrot.slane %v1100_v16, 4  ;;  %v691_v7 = vmul.f32 %v1100_v16, %v1337_v9  ;;  %v1102_v8 = vpop.eup %1101 }
  0xca   :  { %v490_v32 = vrot.slane %v489_v14, 2  ;;  %v486_v39 = vrot.slane %v485_v58, 1  ;;  %v210_v44 = vrot.slane %v1475_v5, 1  ;;  %v1485_v48 = vadd.f32 %v763_v20, %v762_v62  ;;  %v1501_v20 = vpop.xlane.xlu0 %108 }
  0xcb   :  { %v539_v34 = vadd.f32 %v538_v21, %v537_v12  ;;  %v535_v46 = vadd.f32 %v534_v19, %v533_v4  ;;  %v585_v38 = vadd.f32 %v1100_v16, %v584_v37  ;;  %v825_v49 = vsel %vm97_vm0, %v691_v7, 0.0 }
  0xcc   :  { %v491_v40 = vadd.f32 %v490_v32, %v489_v14  ;;  %v1488_v50 = vadd.f32 %v707_v25, %v706_v11  ;;  %v1490_v27 = vadd.f32 %v770_v26, %v769_v57  ;;  %v714_v28 = vrot.slane %v713_v43, 4 }
  0xcd   :  { %v1104_v45 = vpop.eup %1103  ;;  %v540_v9 = vrot.slane %v539_v34, 1  ;;  %v586_v53 = vrot.slane %v585_v38, 2  ;;  %v578_v51 = vrot.slane %v1102_v8, 4  ;;  %v690_v52 = vmul.f32 %v1102_v8, %v1339_v10 }
  0xce   :  { %v492_v54 = vrot.slane %v491_v40, 1  ;;  %v1106_v56 = vpop.eup %1105  ;;  %v487_v59 = vadd.f32 %v486_v39, %v485_v58  ;;  %v826_v60 = vrot.slane %v825_v49, 4  ;;  %v632_v1 = vrot.slane %v1104_v45, 4 }
  0xcf   :  { %v699_v0 = vmul.f32 %v1104_v45, %v1349_v17  ;;  %1107 = vrcp.f32 %v535_v46  ;;  %v587_v62 = vadd.f32 %v586_v53, %v585_v38  ;;  %v579_v63 = vadd.f32 %v1102_v8, %v578_v51 }
  0xd0   :  { %v818_v3 = vsel %vm97_vm0, %v690_v52, 0.0  ;;  %v541_v4 = vadd.f32 %v540_v9, %v539_v34  ;;  %v493_v11 = vadd.f32 %v492_v54, %v491_v40  ;;  %v633_v57 = vadd.f32 %v1104_v45, %v632_v1 }
  0xd1   :  { %v819_v12 = vrot.slane %v818_v3, 4  ;;  %v588_v14 = vrot.slane %v587_v62, 1  ;;  %v580_v15 = vrot.slane %v579_v63, 2  ;;  %v881_v16 = vsel %vm97_vm0, %v699_v0, 0.0 }
  0xd2   :  { %v626_v10 = vrot.slane %v1106_v56, 4  ;;  %1109 = vrcp.f32 %v487_v59  ;;  %v1497_v19 = vadd.f32 %v714_v28, %v713_v43  ;;  %v1499_v17 = vadd.f32 %v826_v60, %v825_v49  ;;  %v1510_v43 = vpop.xlane.xlu1 %180 }
  0xd3   :  { %v1503_v21 = vadd.f32 %v819_v12, %v818_v3  ;;  %v634_v25 = vrot.slane %v633_v57, 2  ;;  %v698_v26 = vmul.f32 %v1106_v56, %v1351_v18  ;;  %v438_v32 = vmul.f32 1.442695, %v396_v6 }
  0xd4   :  { %1111 = vrcp.f32 %v541_v4  ;;  %v882_v7 = vrot.slane %v881_v16, 4  ;;  %v589_v8 = vadd.f32 %v588_v14, %v587_v62  ;;  %v581_v39 = vadd.f32 %v580_v15, %v579_v63 }
  0xd5   :  { %1113 = vrcp.f32 %v493_v11  ;;  %v1508_v40 = vadd.f32 %v1106_v56, %v626_v10  ;;  %v211_v18 = vmax.f32 %v1475_v5, %v210_v44  ;;  %v1516_v38 = vadd.f32 %v634_v25, %v633_v57  ;;  %v1529_v5 = vpop.xlane.xlu0 %156 }
  0xd6   :  { %1115 = vpow2.f32 %v438_v32  ;;  %v1519_v49 = vsel %vm97_vm0, %v698_v26, 0.0  ;;  %v354_v9 = vrot.slane %v1478_v33, 1  ;;  %v1522_v54 = vadd.f32 %v882_v7, %v881_v16  ;;  %v1541_v4 = vpop.xlane.xlu1 %135 }
  0xd7   :  { %v388_v28 = vsub.f32 %v1447_v61, %v211_v18  ;;  %v304_v53 = vrot.slane %v1464_v55, 2  ;;  %v261_v51 = vmax.f32 %v1470_v2, %v260_v22  ;;  %1117 = vrcp.f32 %v589_v8 }
  0xd8   :  { %v582_v52 = vrot.slane %v581_v39, 1  ;;  %v628_v56 = vrot.slane %v1508_v40, 2  ;;  %v355_v59 = vmax.f32 %v1478_v33, %v354_v9  ;;  %v875_v60 = vrot.slane %v1519_v49, 4 }
  0xd9   :  { %v1531_v44 = vpop.eup %1107  ;;  %v422_v1 = vmul.f32 1.442695, %v388_v28  ;;  %v305_v61 = vmax.f32 %v1464_v55, %v304_v53  ;;  %v262_v0 = vrot.slane %v261_v51, 2  ;;  %v636_v62 = vrot.slane %v1516_v38, 1  ;;  %v1553_v7 = vpop.xlane.xlu0 %111 }
  0xda   :  { %2061 = vst [vmem:[#allocation8_spill] sm:$0xff] %v1531_v44  ;;  %v412_v22 = vsub.f32 %v1450_v13, %v355_v59  ;;  %v212_v63 = vrot.slane %v1501_v20, 4  ;;  %v356_v3 = vrot.slane %v1510_v43, 4  ;;  %v308_v57 = vrot.slane %v1529_v5, 4 }
  0xdb   :  { %1119 = vpow2.f32 %v422_v1  ;;  %v306_v33 = vrot.slane %v305_v61, 1  ;;  %v263_v12 = vmax.f32 %v261_v51, %v262_v0  ;;  %v266_v32 = vrot.slane %v1541_v4, 4 }
  0xdc   :  { %v1543_v11 = vpop.eup %1109  ;;  %v470_v14 = vmul.f32 1.442695, %v412_v22  ;;  %v213_v15 = vmax.f32 %v1501_v20, %v212_v63  ;;  %v357_v13 = vmax.f32 %v1510_v43, %v356_v3  ;;  %v309_v26 = vmax.f32 %v1529_v5, %v308_v57 }
  0xdd   :  { %2062 = vst [vmem:[#allocation9_spill] sm:$0xff] %v1543_v11  ;;  %v307_v10 = vmax.f32 %v305_v61, %v306_v33  ;;  %v264_v25 = vrot.slane %v263_v12, 1  ;;  %v583_v18 = vadd.f32 %v582_v52, %v581_v39  ;;  %v267_v61 = vmax.f32 %v1541_v4, %v266_v32 }
  0xde   :  { %v1549_v16 = vpop.eup %1111  ;;  %1121 = vpow2.f32 %v470_v14  ;;  %v214_v9 = vrot.slane %v213_v15, 2  ;;  %v358_v28 = vrot.slane %v357_v13, 2  ;;  %v310_v1 = vrot.slane %v309_v26, 2 }
  0xdf   :  { %2063 = vst [vmem:[#allocation10_spill] sm:$0xff] %v1549_v16  ;;  %v1555_v8 = vpop.eup %1113  ;;  %v404_v51 = vsub.f32 %v1455_v31, %v307_v10  ;;  %v265_v59 = vmax.f32 %v263_v12, %v264_v25  ;;  %v218_v3 = vrot.slane %v1553_v7, 4  ;;  %v268_v39 = vrot.slane %v267_v61, 2 }
  0xe0   :  { %2064 = vst [vmem:[#allocation11_spill] sm:$0xff] %v1555_v8  ;;  %v1116_v53 = vpop.eup %1115  ;;  %v215_v22 = vmax.f32 %v213_v15, %v214_v9  ;;  %v359_v63 = vmax.f32 %v357_v13, %v358_v28  ;;  %v311_v55 = vmax.f32 %v309_v26, %v310_v1  ;;  %v629_v14 = vadd.f32 %v628_v56, %v1508_v40 }
  0xe1   :  { %v542_v0 = vrot.slane %v1116_v53, 4  ;;  %v454_v33 = vmul.f32 1.442695, %v404_v51  ;;  %v397_v57 = vsub.f32 %v1470_v2, %v265_v59  ;;  %v1561_v52 = vpop.eup %1117  ;;  %v684_v10 = vmul.f32 %v1116_v53, %v1359_v23 }
  0xe2   :  { %2065 = vst [vmem:[#allocation12_spill] sm:$0xff] %v1561_v52  ;;  %v216_v31 = vrot.slane %v215_v22, 1  ;;  %v360_v12 = vrot.slane %v359_v63, 1  ;;  %v312_v15 = vrot.slane %v311_v55, 1  ;;  %v269_v28 = vmax.f32 %v267_v61, %v268_v39 }
  0xe3   :  { %v543_v46 = vadd.f32 %v1116_v53, %v542_v0  ;;  %1123 = vpow2.f32 %v454_v33  ;;  %v440_v25 = vmul.f32 1.442695, %v397_v57  ;;  %v1566_v2 = vadd.f32 %v875_v60, %v1519_v49 }
  0xe4   :  { %v217_v32 = vmax.f32 %v215_v22, %v216_v31  ;;  %v361_v9 = vmax.f32 %v359_v63, %v360_v12  ;;  %v313_v26 = vmax.f32 %v311_v55, %v312_v15  ;;  %v219_v40 = vmax.f32 %v1553_v7, %v218_v3 }
  0xe5   :  { %v544_v13 = vrot.slane %v543_v46, 2  ;;  %v1120_v51 = vpop.eup %1119  ;;  %1125 = vpow2.f32 %v440_v25  ;;  %v630_v53 = vrot.slane %v629_v14, 1  ;;  %v776_v1 = vsel %vm97_vm0, %v684_v10, 0.0 }
  0xe6   :  { %1127 = vrcp.f32 %v583_v18  ;;  %v494_v56 = vrot.slane %v1120_v51, 4  ;;  %v676_v59 = vmul.f32 %v1120_v51, %v1361_v24  ;;  %v389_v23 = vsub.f32 %v1501_v20, %v217_v32 }
  0xe7   :  { %v413_v0 = vsub.f32 %v1510_v43, %v361_v9  ;;  %v405_v61 = vsub.f32 %v1529_v5, %v313_v26  ;;  %v545_v49 = vadd.f32 %v544_v13, %v543_v46  ;;  %v270_v55 = vrot.slane %v269_v28, 1  ;;  %v1578_v43 = vpop.xlane.xlu1 %183 }
  0xe8   :  { %v1122_v22 = vpop.eup %1121  ;;  %v495_v60 = vadd.f32 %v1120_v51, %v494_v56  ;;  %v424_v63 = vmul.f32 1.442695, %v389_v23  ;;  %v720_v3 = vsel %vm97_vm0, %v676_v59, 0.0  ;;  %v220_v57 = vrot.slane %v219_v40, 2 }
  0xe9   :  { %v638_v18 = vrot.slane %v1122_v22, 4  ;;  %v472_v33 = vmul.f32 1.442695, %v413_v0  ;;  %v637_v24 = vadd.f32 %v636_v62, %v1516_v38  ;;  %v456_v39 = vmul.f32 1.442695, %v405_v61 }
  0xea   :  { %v496_v20 = vrot.slane %v495_v60, 2  ;;  %1129 = vpow2.f32 %v424_v63  ;;  %v631_v5 = vadd.f32 %v630_v53, %v629_v14  ;;  %v546_v12 = vrot.slane %v545_v49, 1 }
  0xeb   :  { %v639_v31 = vadd.f32 %v1122_v22, %v638_v18  ;;  %1131 = vpow2.f32 %v472_v33  ;;  %v777_v10 = vrot.slane %v776_v1, 4  ;;  %v721_v25 = vrot.slane %v720_v3, 4 }
  0xec   :  { %v271_v15 = vmax.f32 %v269_v28, %v270_v55  ;;  %1133 = vpow2.f32 %v456_v39  ;;  %v221_v9 = vmax.f32 %v219_v40, %v220_v57  ;;  %v362_v38 = vrot.slane %v1578_v43, 4 }
  0xed   :  { %v1124_v13 = vpop.eup %1123  ;;  %v640_v32 = vrot.slane %v639_v31, 2  ;;  %1135 = vrcp.f32 %v637_v24  ;;  %v497_v62 = vadd.f32 %v496_v20, %v495_v60  ;;  %v700_v51 = vmul.f32 %v1122_v22, %v1369_v29  ;;  %v1592_v22 = vpop.xlane.xlu0 %159 }
  0xee   :  { %v590_v26 = vrot.slane %v1124_v13, 4  ;;  %v692_v56 = vmul.f32 %v1124_v13, %v1371_v30  ;;  %v398_v59 = vsub.f32 %v1541_v4, %v271_v15  ;;  %v222_v23 = vrot.slane %v221_v9, 1 }
  0xef   :  { %v1126_v14 = vpop.eup %1125  ;;  %v363_v53 = vmax.f32 %v1578_v43, %v362_v38  ;;  %1137 = vrcp.f32 %v631_v5  ;;  %v641_v0 = vadd.f32 %v640_v32, %v639_v31  ;;  %v547_v63 = vadd.f32 %v546_v12, %v545_v49  ;;  %v1598_v38 = vpop.xlane.xlu1 %138 }
  0xf0   :  { %v1586_v28 = vpop.eup %1127  ;;  %v591_v40 = vadd.f32 %v1124_v13, %v590_v26  ;;  %v548_v61 = vrot.slane %v1126_v14, 4  ;;  %v1588_v55 = vadd.f32 %v777_v10, %v776_v1  ;;  %v1590_v60 = vadd.f32 %v721_v25, %v720_v3 }
  0xf1   :  { %2066 = vst [vmem:[#allocation13_spill] sm:$0xff] %v1586_v28  ;;  %v442_v29 = vmul.f32 1.442695, %v398_v59  ;;  %v498_v30 = vrot.slane %v497_v62, 1  ;;  %v223_v33 = vmax.f32 %v221_v9, %v222_v23  ;;  %v888_v57 = vsel %vm97_vm0, %v700_v51, 0.0 }
  0xf2   :  { %v592_v18 = vrot.slane %v591_v40, 2  ;;  %v549_v4 = vadd.f32 %v1126_v14, %v548_v61  ;;  %v832_v24 = vsel %vm97_vm0, %v692_v56, 0.0  ;;  %v364_v20 = vrot.slane %v363_v53, 2 }
  0xf3   :  { %1139 = vpow2.f32 %v442_v29  ;;  %v642_v5 = vrot.slane %v641_v0, 1  ;;  %v390_v1 = vsub.f32 %v1553_v7, %v223_v33  ;;  %v314_v3 = vrot.slane %v1592_v22, 4 }
  0xf4   :  { %v1130_v39 = vpop.eup %1129  ;;  %v550_v49 = vrot.slane %v549_v4, 2  ;;  %1141 = vrcp.f32 %v547_v63  ;;  %v593_v12 = vadd.f32 %v592_v18, %v591_v40  ;;  %v365_v25 = vmax.f32 %v363_v53, %v364_v20 }
  0xf5   :  { %v1132_v31 = vpop.eup %1131  ;;  %v500_v10 = vrot.slane %v1130_v39, 4  ;;  %v499_v15 = vadd.f32 %v498_v30, %v497_v62  ;;  %v889_v13 = vrot.slane %v888_v57, 4  ;;  %v833_v32 = vrot.slane %v832_v24, 4  ;;  %v1603_v30 = vpop.xlane.xlu0 %114 }
  0xf6   :  { %v644_v9 = vrot.slane %v1132_v31, 4  ;;  %v1134_v51 = vpop.eup %1133  ;;  %v426_v56 = vmul.f32 1.442695, %v390_v1  ;;  %v366_v59 = vrot.slane %v365_v25, 1  ;;  %v315_v23 = vmax.f32 %v1592_v22, %v314_v3 }
  0xf7   :  { %v501_v26 = vadd.f32 %v1130_v39, %v500_v10  ;;  %v1601_v7 = vpop.eup %1135  ;;  %v643_v61 = vadd.f32 %v642_v5, %v641_v0  ;;  %v551_v29 = vadd.f32 %v550_v49, %v549_v4  ;;  %v596_v40 = vrot.slane %v1134_v51, 4 }
  0xf8   :  { %2067 = vst [vmem:[#allocation14_spill] sm:$0xff] %v1601_v7  ;;  %v645_v63 = vadd.f32 %v1132_v31, %v644_v9  ;;  %v594_v18 = vrot.slane %v593_v12, 1  ;;  %1143 = vpow2.f32 %v426_v56  ;;  %v367_v62 = vmax.f32 %v365_v25, %v366_v59  ;;  %v1617_v59 = vpop.xlane.xlu1 %186 }
  0xf9   :  { %v502_v53 = vrot.slane %v501_v26, 2  ;;  %v1605_v33 = vpop.eup %1137  ;;  %1145 = vrcp.f32 %v499_v15  ;;  %v1607_v20 = vadd.f32 %v889_v13, %v888_v57  ;;  %v1610_v1 = vmul.f32 %v1126_v14, %v1379_v35 }
  0xfa   :  { %2068 = vst [vmem:[#allocation15_spill] sm:$0xff] %v1605_v33  ;;  %v646_v3 = vrot.slane %v645_v63, 2  ;;  %v1612_v10 = vadd.f32 %v833_v32, %v832_v24  ;;  %v414_v0 = vsub.f32 %v1578_v43, %v367_v62  ;;  %v316_v4 = vrot.slane %v315_v23, 2 }
  0xfb   :  { %v272_v5 = vrot.slane %v1598_v38, 4  ;;  %v552_v49 = vrot.slane %v551_v29, 1  ;;  %v503_v25 = vadd.f32 %v502_v53, %v501_v26  ;;  %v597_v9 = vadd.f32 %v1134_v51, %v596_v40 }
  0xfc   :  { %v224_v56 = vrot.slane %v1603_v30, 4  ;;  %1147 = vrcp.f32 %v643_v61  ;;  %v595_v15 = vadd.f32 %v594_v18, %v593_v12  ;;  %v317_v35 = vmax.f32 %v315_v23, %v316_v4 }
  0xfd   :  { %v1140_v57 = vpop.eup %1139  ;;  %v273_v14 = vmax.f32 %v1598_v38, %v272_v5  ;;  %v1621_v24 = vmul.f32 %v1130_v39, %v1381_v36  ;;  %v647_v43 = vadd.f32 %v646_v3, %v645_v63  ;;  %v474_v32 = vmul.f32 1.442695, %v414_v0  ;;  %v1632_v36 = vpop.xlane.xlu0 %162 }
  0xfe   :  { %v554_v13 = vrot.slane %v1140_v57, 4  ;;  %v1623_v62 = vpop.eup %1141  ;;  %v1626_v26 = vmul.f32 %v1132_v31, %v1389_v41  ;;  %v1629_v40 = vmul.f32 %v1134_v51, %v1391_v42  ;;  %v318_v53 = vrot.slane %v317_v35, 1  ;;  %v1635_v42 = vpop.xlane.xlu1 %141 }
  0xff   :  { %2069 = vst [vmem:[#allocation16_spill] sm:$0xff] %v1623_v62  ;;  %v274_v61 = vrot.slane %v273_v14, 2  ;;  %v553_v12 = vadd.f32 %v552_v49, %v551_v29  ;;  %v504_v23 = vrot.slane %v503_v25, 1  ;;  %v598_v18 = vrot.slane %v597_v9, 2 }
 0x100   :  { %v225_v4 = vmax.f32 %v1603_v30, %v224_v56  ;;  %1149 = vrcp.f32 %v595_v15  ;;  %v319_v39 = vmax.f32 %v317_v35, %v318_v53  ;;  %v368_v3 = vrot.slane %v1617_v59, 4 }
 0x101   :  { %v275_v63 = vmax.f32 %v273_v14, %v274_v61  ;;  %v648_v0 = vrot.slane %v647_v43, 1  ;;  %v555_v41 = vadd.f32 %v1140_v57, %v554_v13  ;;  %1151 = vpow2.f32 %v474_v32  ;;  %v1650_v37 = vpop.xlane.xlu0 %117 }
 0x102   :  { %v226_v31 = vrot.slane %v225_v4, 2  ;;  %v1637_v51 = vpop.eup %1143  ;;  %v406_v29 = vsub.f32 %v1592_v22, %v319_v39  ;;  %v369_v49 = vmax.f32 %v1617_v59, %v368_v3  ;;  %v320_v56 = vrot.slane %v1632_v36, 4 }
 0x103   :  { %v276_v5 = vrot.slane %v275_v63, 1  ;;  %v1642_v15 = vpop.eup %1145  ;;  %1153 = vrcp.f32 %v553_v12  ;;  %v505_v35 = vadd.f32 %v504_v23, %v503_v25  ;;  %v599_v14 = vadd.f32 %v598_v18, %v597_v9 }
 0x104   :  { %2070 = vst [vmem:[#allocation17_spill] sm:$0xff] %v1642_v15  ;;  %v1645_v13 = vmul.f32 %v1140_v57, %v1399_v47  ;;  %v458_v32 = vmul.f32 1.442695, %v406_v29  ;;  %v227_v61 = vmax.f32 %v225_v4, %v226_v31  ;;  %v370_v46 = vrot.slane %v369_v49, 2  ;;  %v1656_v4 = vpop.xlane.xlu1 %189 }
 0x105   :  { %v277_v53 = vmax.f32 %v275_v63, %v276_v5  ;;  %v556_v6 = vrot.slane %v555_v41, 2  ;;  %v506_v22 = vrot.slane %v1637_v51, 4  ;;  %v321_v39 = vmax.f32 %v1632_v36, %v320_v56 }
 0x106   :  { %v278_v3 = vrot.slane %v1635_v42, 4  ;;  %v1652_v58 = vpop.eup %1147  ;;  %v649_v25 = vadd.f32 %v648_v0, %v647_v43  ;;  %v228_v47 = vrot.slane %v227_v61, 1  ;;  %v371_v57 = vmax.f32 %v369_v49, %v370_v46 }
 0x107   :  { %2071 = vst [vmem:[#allocation18_spill] sm:$0xff] %v1652_v58  ;;  %v399_v9 = vsub.f32 %v1598_v38, %v277_v53  ;;  %v600_v12 = vrot.slane %v599_v14, 1  ;;  %1155 = vpow2.f32 %v458_v32  ;;  %v322_v23 = vrot.slane %v321_v39, 2 }
 0x108   :  { %v279_v18 = vmax.f32 %v1635_v42, %v278_v3  ;;  %v229_v31 = vmax.f32 %v227_v61, %v228_v47  ;;  %v372_v29 = vrot.slane %v371_v57, 1  ;;  %v230_v5 = vrot.slane %v1650_v37, 4 }
 0x109   :  { %v444_v63 = vmul.f32 1.442695, %v399_v9  ;;  %1157 = vrcp.f32 %v505_v35  ;;  %v557_v56 = vadd.f32 %v556_v6, %v555_v41  ;;  %v507_v43 = vadd.f32 %v1637_v51, %v506_v22  ;;  %v1666_v22 = vpop.xlane.xlu0 %165 }
 0x10a   :  { %v323_v0 = vmax.f32 %v321_v39, %v322_v23  ;;  %v1660_v38 = vpop.eup %1149  ;;  %v391_v46 = vsub.f32 %v1603_v30, %v229_v31  ;;  %v373_v49 = vmax.f32 %v371_v57, %v372_v29  ;;  %v280_v32 = vrot.slane %v279_v18, 2  ;;  %v1670_v31 = vpop.xlane.xlu1 %144 }
 0x10b   :  { %2072 = vst [vmem:[#allocation19_spill] sm:$0xff] %v1660_v38  ;;  %1159 = vpow2.f32 %v444_v63  ;;  %v1152_v53 = vpop.eup %1151  ;;  %v601_v3 = vadd.f32 %v600_v12, %v599_v14  ;;  %v231_v61 = vmax.f32 %v1650_v37, %v230_v5  ;;  %v374_v41 = vrot.slane %v1656_v4, 4 }
 0x10c   :  { %1161 = vrcp.f32 %v649_v25  ;;  %v324_v9 = vrot.slane %v323_v0, 1  ;;  %v428_v47 = vmul.f32 1.442695, %v391_v46  ;;  %v415_v35 = vsub.f32 %v1617_v59, %v373_v49 }
 0x10d   :  { %v281_v6 = vmax.f32 %v279_v18, %v280_v32  ;;  %v1668_v39 = vpop.eup %1153  ;;  %v558_v23 = vrot.slane %v557_v56, 1  ;;  %v508_v30 = vrot.slane %v507_v43, 2  ;;  %v232_v63 = vrot.slane %v231_v61, 2 }
 0x10e   :  { %2073 = vst [vmem:[#allocation20_spill] sm:$0xff] %v1668_v39  ;;  %v325_v57 = vmax.f32 %v323_v0, %v324_v9  ;;  %1163 = vpow2.f32 %v428_v47  ;;  %v476_v14 = vmul.f32 1.442695, %v415_v35  ;;  %v375_v12 = vmax.f32 %v1656_v4, %v374_v41  ;;  %v1219_v47 = vld [vmem:[#allocation2 + $0x20] sm:$0xff] }
 0x10f   :  { %v282_v25 = vrot.slane %v281_v6, 1  ;;  %v650_v29 = vrot.slane %v1152_v53, 4  ;;  %v233_v18 = vmax.f32 %v231_v61, %v232_v63  ;;  %v326_v5 = vrot.slane %v1666_v22, 4 }
 0x110   :  { %v407_v59 = vsub.f32 %v1632_v36, %v325_v57  ;;  %1165 = vpow2.f32 %v476_v14  ;;  %v376_v49 = vrot.slane %v375_v12, 2  ;;  %v284_v32 = vrot.slane %v1670_v31, 4 }
 0x111   :  { %v283_v46 = vmax.f32 %v281_v6, %v282_v25  ;;  %v1676_v0 = vpop.eup %1155  ;;  %1167 = vrcp.f32 %v601_v3  ;;  %v1678_v9 = vadd.f32 %v558_v23, %v557_v56  ;;  %v1681_v35 = vmul.f32 %v1219_v47, %v1637_v51  ;;  %v1685_v6 = vpop.xlane.xlu0 %120 }
 0x112   :  { %v460_v41 = vmul.f32 1.442695, %v407_v59  ;;  %v234_v61 = vrot.slane %v233_v18, 1  ;;  %v377_v57 = vmax.f32 %v375_v12, %v376_v49  ;;  %v327_v63 = vmax.f32 %v1666_v22, %v326_v5  ;;  %v1220_v12 = vld [vmem:[#allocation2 + $0xe0] sm:$0xff] }
 0x113   :  { %2074 = vst [vmem:[#allocation21_spill] sm:$0xff] %v1678_v9  ;;  %v400_v36 = vsub.f32 %v1635_v42, %v283_v46  ;;  %v1687_v14 = vpop.eup %1157  ;;  %v1689_v25 = vadd.f32 %v508_v30, %v507_v43  ;;  %v651_v3 = vadd.f32 %v1152_v53, %v650_v29  ;;  %v285_v56 = vmax.f32 %v1670_v31, %v284_v32  ;;  %v1221_v9 = vld [vmem:[#allocation2 + $0xa0] sm:$0xff] }
 0x114   :  { %2075 = vst [vmem:[#allocation22_spill] sm:$0xff] %v1687_v14  ;;  %1169 = vpow2.f32 %v460_v41  ;;  %v235_v59 = vmax.f32 %v233_v18, %v234_v61  ;;  %v378_v47 = vrot.slane %v377_v57, 1  ;;  %v328_v42 = vrot.slane %v327_v63, 2  ;;  %v1701_v41 = vpop.xlane.xlu1 %192 }
 0x115   :  { %v1692_v23 = vpop.eup %1159  ;;  %v446_v51 = vmul.f32 1.442695, %v400_v36  ;;  %v1696_v5 = vmul.f32 %v1220_v12, %v1152_v53  ;;  %v602_v49 = vrot.slane %v1676_v0, 4  ;;  %v286_v45 = vrot.slane %v285_v56, 2 }
 0x116   :  { %v1694_v46 = vpop.eup %1161  ;;  %v236_v43 = vrot.slane %v1685_v6, 4  ;;  %v392_v30 = vsub.f32 %v1650_v37, %v235_v59  ;;  %v379_v29 = vmax.f32 %v377_v57, %v378_v47  ;;  %v329_v32 = vmax.f32 %v327_v63, %v328_v42 }
 0x117   :  { %2076 = vst [vmem:[#allocation23_spill] sm:$0xff] %v1694_v46  ;;  %1171 = vpow2.f32 %v446_v51  ;;  %v652_v18 = vrot.slane %v651_v3, 2  ;;  %v560_v36 = vrot.slane %v1692_v23, 4  ;;  %v287_v61 = vmax.f32 %v285_v56, %v286_v45 }
 0x118   :  { %v237_v34 = vmax.f32 %v1685_v6, %v236_v43  ;;  %v1705_v53 = vpop.eup %1163  ;;  %v510_v12 = vrot.slane %v1689_v25, 1  ;;  %v430_v46 = vmul.f32 1.442695, %v392_v30  ;;  %v416_v58 = vsub.f32 %v1656_v4, %v379_v29  ;;  %v1714_v43 = vpop.xlane.xlu0 %168 }
 0x119   :  { %v330_v51 = vrot.slane %v329_v32, 1  ;;  %v603_v37 = vadd.f32 %v1676_v0, %v602_v49  ;;  %v512_v57 = vrot.slane %v1705_v53, 4  ;;  %v288_v63 = vrot.slane %v287_v61, 1 }
 0x11a   :  { %v380_v59 = vrot.slane %v1701_v41, 4  ;;  %v1712_v47 = vpop.eup %1165  ;;  %1173 = vpow2.f32 %v430_v46  ;;  %v478_v45 = vmul.f32 1.442695, %v416_v58  ;;  %v238_v42 = vrot.slane %v237_v34, 2 }
 0x11b   :  { %v331_v56 = vmax.f32 %v329_v32, %v330_v51  ;;  %v1716_v7 = vpop.eup %1167  ;;  %v1718_v30 = vadd.f32 %v652_v18, %v651_v3  ;;  %v561_v4 = vadd.f32 %v1692_v23, %v560_v36  ;;  %v513_v49 = vadd.f32 %v1705_v53, %v512_v57 }
 0x11c   :  { %2077 = vst [vmem:[#allocation24_spill] sm:$0xff] %v1716_v7  ;;  %v656_v29 = vrot.slane %v1712_v47, 4  ;;  %1175 = vpow2.f32 %v478_v45  ;;  %v289_v38 = vmax.f32 %v287_v61, %v288_v63  ;;  %v239_v46 = vmax.f32 %v237_v34, %v238_v42 }
 0x11d   :  { %v408_v33 = vsub.f32 %v1666_v22, %v331_v56  ;;  %v604_v32 = vrot.slane %v603_v37, 2  ;;  %v381_v7 = vmax.f32 %v1701_v41, %v380_v59  ;;  %v332_v3 = vrot.slane %v1714_v43, 4 }
 0x11e   :  { %v1724_v58 = vpop.eup %1169  ;;  %v657_v51 = vadd.f32 %v1712_v47, %v656_v29  ;;  %v401_v57 = vsub.f32 %v1670_v31, %v289_v38  ;;  %v240_v52 = vrot.slane %v239_v46, 1  ;;  %v562_v45 = vrot.slane %v561_v4, 2 }
 0x11f   :  { %v608_v18 = vrot.slane %v1724_v58, 4  ;;  %v462_v36 = vmul.f32 1.442695, %v408_v33  ;;  %v514_v28 = vrot.slane %v513_v49, 2  ;;  %v382_v22 = vrot.slane %v381_v7, 2 }
 0x120   :  { %v333_v34 = vmax.f32 %v1714_v43, %v332_v3  ;;  %v448_v56 = vmul.f32 1.442695, %v401_v57  ;;  %v241_v59 = vmax.f32 %v239_v46, %v240_v52  ;;  %v605_v42 = vadd.f32 %v604_v32, %v603_v37 }
 0x121   :  { %v1732_v61 = vpop.eup %1171  ;;  %v609_v63 = vadd.f32 %v1724_v58, %v608_v18  ;;  %1177 = vpow2.f32 %v462_v36  ;;  %v383_v39 = vmax.f32 %v381_v7, %v382_v22  ;;  %v658_v62 = vrot.slane %v657_v51, 2 }
 0x122   :  { %v566_v29 = vrot.slane %v1732_v61, 4  ;;  %v334_v33 = vrot.slane %v333_v34, 2  ;;  %1179 = vpow2.f32 %v448_v56  ;;  %v393_v31 = vsub.f32 %v1685_v6, %v241_v59 }
 0x123   :  { %v610_v38 = vrot.slane %v609_v63, 2  ;;  %v1738_v16 = vadd.f32 %v510_v12, %v1689_v25  ;;  %v384_v44 = vrot.slane %v383_v39, 1  ;;  %v654_v52 = vrot.slane %v1718_v30, 1 }
 0x124   :  { %v567_v3 = vadd.f32 %v1732_v61, %v566_v29  ;;  %v335_v18 = vmax.f32 %v333_v34, %v334_v33  ;;  %v1174_v36 = vpop.eup %1173  ;;  %v563_v37 = vadd.f32 %v562_v45, %v561_v4  ;;  %v515_v46 = vadd.f32 %v514_v28, %v513_v49 }
 0x125   :  { %v432_v32 = vmul.f32 1.442695, %v393_v31  ;;  %v518_v57 = vrot.slane %v1174_v36, 4  ;;  %v385_v22 = vmax.f32 %v383_v39, %v384_v44  ;;  %v606_v6 = vrot.slane %v605_v42, 1 }
 0x126   :  { %v568_v7 = vrot.slane %v567_v3, 2  ;;  %v336_v14 = vrot.slane %v335_v18, 1  ;;  %v1742_v56 = vpop.eup %1175  ;;  %v659_v59 = vadd.f32 %v658_v62, %v657_v51  ;;  %v611_v25 = vadd.f32 %v610_v38, %v609_v63 }
 0x127   :  { %1181 = vpow2.f32 %v432_v32  ;;  %v519_v12 = vadd.f32 %v1174_v36, %v518_v57  ;;  %v662_v29 = vrot.slane %v1742_v56, 4  ;;  %v417_v34 = vsub.f32 %v1701_v41, %v385_v22 }
 0x128   :  { %v337_v33 = vmax.f32 %v335_v18, %v336_v14  ;;  %v1747_v28 = vmul.f32 %v1221_v9, %v1676_v0  ;;  %v516_v4 = vrot.slane %v515_v46, 1  ;;  %v564_v49 = vrot.slane %v563_v37, 1 }
 0x129   :  { %v569_v44 = vadd.f32 %v568_v7, %v567_v3  ;;  %v520_v39 = vrot.slane %v519_v12, 2  ;;  %v663_v45 = vadd.f32 %v1742_v56, %v662_v29  ;;  %v480_v31 = vmul.f32 1.442695, %v417_v34 }
 0x12a   :  { %v409_v62 = vsub.f32 %v1714_v43, %v337_v33  ;;  %v1752_v63 = vadd.f32 %v654_v52, %v1718_v30  ;;  %v1754_v38 = vadd.f32 %v606_v6, %v605_v42  ;;  %v612_v14 = vrot.slane %v611_v25, 1  ;;  %v1222_v6 = vld [vmem:[#allocation2 + $0x28] sm:$0xff]  ;;  %v1223_v33 = vld [vmem:[#allocation2 + $0x30] sm:$0xff] }
 0x12b   :  { %v1178_v51 = vpop.eup %1177  ;;  %v660_v41 = vrot.slane %v659_v59, 1  ;;  %v664_v18 = vrot.slane %v663_v45, 2  ;;  %1183 = vpow2.f32 %v480_v31  ;;  %v1756_v3 = vadd.f32 %v516_v4, %v515_v46  ;;  %v1224_v46 = vld [vmem:[#allocation2 + $0x68] sm:$0xff] }
 0x12c   :  { %2078 = vst [vmem:[#allocation25_spill] sm:$0xff] %v1752_v63  ;;  %2079 = vst [vmem:[#allocation26_spill] sm:$0xff] %v1754_v38  ;;  %v614_v0 = vrot.slane %v1178_v51, 4  ;;  %v464_v9 = vmul.f32 1.442695, %v409_v62  ;;  %v1180_v32 = vpop.eup %1179  ;;  %v521_v7 = vadd.f32 %v520_v39, %v519_v12  ;;  %v1758_v57 = vadd.f32 %v564_v49, %v563_v37  ;;  %v1225_v37 = vld [vmem:[#allocation2 + $0x70] sm:$0xff] }
 0x12d   :  { %v570_v22 = vrot.slane %v569_v44, 1  ;;  %v572_v29 = vrot.slane %v1180_v32, 4  ;;  %v665_v30 = vadd.f32 %v664_v18, %v663_v45  ;;  %v1760_v52 = vadd.f32 %v612_v14, %v611_v25  ;;  %v1226_v49 = vld [vmem:[#allocation2 + $0xa8] sm:$0xff] }
 0x12e   :  { %2080 = vst [vmem:[#allocation27_spill] sm:$0xff] %v1758_v57  ;;  %v615_v43 = vadd.f32 %v1178_v51, %v614_v0  ;;  %1185 = vpow2.f32 %v464_v9  ;;  %v1762_v42 = vadd.f32 %v660_v41, %v659_v59  ;;  %v679_v34 = vmul.f32 %v1222_v6, %v1705_v53  ;;  %v1228_v9 = vld [vmem:[#allocation2 + $0x78] sm:$0xff] }
 0x12f   :  { %2081 = vst [vmem:[#allocation28_spill] sm:$0xff] %v1760_v52  ;;  %v680_v31 = vmul.f32 %v1223_v33, %v1174_v36  ;;  %v573_v62 = vadd.f32 %v1180_v32, %v572_v29  ;;  %v1766_v12 = vmul.f32 %v1224_v46, %v1692_v23  ;;  %v1769_v4 = vmul.f32 %v1225_v37, %v1732_v61  ;;  %v1227_v61 = vld [vmem:[#allocation2 + $0xb0] sm:$0xff]  ;;  %v1229_v29 = vld [vmem:[#allocation2 + $0xe8] sm:$0xff] }
 0x130   :  { %2082 = vst [vmem:[#allocation29_spill] sm:$0xff] %v1762_v42  ;;  %v1772_v25 = vmul.f32 %v1226_v49, %v1724_v58  ;;  %v522_v39 = vrot.slane %v521_v7, 1  ;;  %v1774_v45 = vadd.f32 %v570_v22, %v569_v44  ;;  %v2084_v53 = vrot.slane %v1488_v50, 2  ;;  %v1230_v22 = vld [vmem:[#allocation2 + $0xf0] sm:$0xff] }
 0x131   :  { %v1182_v59 = vpop.eup %1181  ;;  %v727_v23 = vsel %vm97_vm0, %v1621_v24, 0.0  ;;  %v616_v14 = vrot.slane %v615_v43, 2  ;;  %v666_v18 = vrot.slane %v665_v30, 1  ;;  %v1781_v0 = vmul.f32 %v1227_v61, %v1178_v51 }
 0x132   :  { %2083 = vst [vmem:[#allocation30_spill] sm:$0xff] %v1774_v45  ;;  %v710_v36 = vadd.f32 %v2084_v53, %v1488_v50  ;;  %v524_v41 = vrot.slane %v1182_v59, 4  ;;  %v1783_v58 = vmul.f32 %v1228_v9, %v1180_v32  ;;  %v1786_v44 = vmul.f32 %v1229_v29, %v1712_v47 }
 0x133   :  { %v1789_v6 = vmul.f32 %v1230_v22, %v1742_v56  ;;  %v2085_v50 = vrot.slane %v1497_v19, 2  ;;  %v574_v46 = vrot.slane %v573_v62, 2  ;;  %v723_v51 = vrot.slane %v1590_v60, 2 }
 0x134   :  { %v525_v33 = vadd.f32 %v1182_v59, %v524_v41  ;;  %v728_v37 = vrot.slane %v727_v23, 4  ;;  %v1795_v49 = vadd.f32 %v522_v39, %v521_v7  ;;  %v711_v32 = vrot.slane %v710_v36, 1  ;;  %v1231_v41 = vld [vmem:[#allocation2 + $0x38] sm:$0xff] }
 0x135   :  { %v717_v24 = vadd.f32 %v2085_v50, %v1497_v19  ;;  %v734_v47 = vsel %vm97_vm0, %v1681_v35, 0.0  ;;  %v741_v53 = vsel %vm97_vm0, %v679_v34, 0.0  ;;  %v1184_v61 = vpop.eup %1183  ;;  %v617_v9 = vadd.f32 %v616_v14, %v615_v43 }
 0x136   :  { %v526_v56 = vrot.slane %v525_v33, 2  ;;  %v1800_v29 = vadd.f32 %v666_v18, %v665_v30  ;;  %v729_v22 = vadd.f32 %v728_v37, %v727_v23  ;;  %v668_v19 = vrot.slane %v1184_v61, 4 }
 0x137   :  { %v681_v50 = vmul.f32 %v1231_v41, %v1182_v59  ;;  %v718_v42 = vrot.slane %v717_v24, 1  ;;  %v735_v63 = vrot.slane %v734_v47, 4  ;;  %v575_v7 = vadd.f32 %v574_v46, %v573_v62 }
 0x138   :  { %2086 = vst [vmem:[#allocation31_spill] sm:$0xff] %v1800_v29  ;;  %v1186_v52 = vpop.eup %1185  ;;  %v724_v39 = vadd.f32 %v723_v51, %v1590_v60  ;;  %v730_v38 = vrot.slane %v729_v22, 2  ;;  %v742_v45 = vrot.slane %v741_v53, 4  ;;  %v669_v35 = vadd.f32 %v1184_v61, %v668_v19 }
 0x139   :  { %v620_v57 = vrot.slane %v1186_v52, 4  ;;  %v527_v34 = vadd.f32 %v526_v56, %v525_v33  ;;  %v736_v15 = vadd.f32 %v735_v63, %v734_v47  ;;  %v618_v8 = vrot.slane %v617_v9, 1 }
 0x13a   :  { %v731_v43 = vadd.f32 %v730_v38, %v729_v22  ;;  %v743_v30 = vadd.f32 %v742_v45, %v741_v53  ;;  %v748_v23 = vsel %vm97_vm0, %v680_v31, 0.0  ;;  %v670_v14 = vrot.slane %v669_v35, 2  ;;  %v1232_v22 = vld [vmem:[#allocation2 + $0xf8] sm:$0xff] }
 0x13b   :  { %v621_v18 = vadd.f32 %v1186_v52, %v620_v57  ;;  %v737_v59 = vrot.slane %v736_v15, 2  ;;  %v749_v37 = vrot.slane %v748_v23, 4  ;;  %v1804_v41 = vadd.f32 %v711_v32, %v710_v36 }
 0x13c   :  { %v725_v62 = vrot.slane %v724_v39, 1  ;;  %v744_v46 = vrot.slane %v743_v30, 2  ;;  %v755_v60 = vsel %vm97_vm0, %v681_v50, 0.0  ;;  %v528_v19 = vrot.slane %v527_v34, 1 }
 0x13d   :  { %v622_v51 = vrot.slane %v621_v18, 2  ;;  %v576_v29 = vrot.slane %v575_v7, 1  ;;  %v750_v33 = vadd.f32 %v749_v37, %v748_v23  ;;  %v671_v63 = vadd.f32 %v670_v14, %v669_v35 }
 0x13e   :  { %v732_v47 = vrot.slane %v731_v43, 1  ;;  %v738_v38 = vadd.f32 %v737_v59, %v736_v15  ;;  %v756_v45 = vrot.slane %v755_v60, 4  ;;  %v1807_v53 = vadd.f32 %v618_v8, %v617_v9  ;;  %v1233_v8 = vld [vmem:[#allocation2 + $0xb8] sm:$0xff] }
 0x13f   :  { %v1809_v31 = vadd.f32 %v718_v42, %v717_v24  ;;  %v745_v57 = vadd.f32 %v744_v46, %v743_v30  ;;  %v2087_v36 = vrot.slane %v1485_v48, 2  ;;  %v623_v56 = vadd.f32 %v622_v51, %v621_v18 }
 0x140   :  { %v1814_v50 = vmul.f32 %v1232_v22, %v1184_v61  ;;  %v1816_v11 = vadd.f32 %v725_v62, %v724_v39  ;;  %v757_v23 = vadd.f32 %v756_v45, %v755_v60  ;;  %v1818_v35 = vadd.f32 %v528_v19, %v527_v34 }
 0x141   :  { %v766_v32 = vadd.f32 %v2087_v36, %v1485_v48  ;;  %v1820_v15 = vadd.f32 %v576_v29, %v575_v7  ;;  %v1822_v9 = vmul.f32 %v1233_v8, %v1186_v52  ;;  %v751_v42 = vrot.slane %v750_v33, 2 }
 0x142   :  { %v672_v24 = vrot.slane %v671_v63, 1  ;;  %v1824_v30 = vadd.f32 %v732_v47, %v731_v43  ;;  %v739_v14 = vrot.slane %v738_v38, 1  ;;  %v758_v48 = vrot.slane %v757_v23, 2 }
 0x143   :  { %v746_v18 = vrot.slane %v745_v57, 1  ;;  %v767_v59 = vrot.slane %v766_v32, 1  ;;  %v779_v61 = vrot.slane %v1588_v55, 2  ;;  %v783_v39 = vsel %vm97_vm0, %v1610_v1, 0.0 }
 0x144   :  { %v624_v34 = vrot.slane %v623_v56, 1  ;;  %v2088_v29 = vrot.slane %v1490_v27, 2  ;;  %v784_v52 = vrot.slane %v783_v39, 4  ;;  %v790_v37 = vsel %vm97_vm0, %v1645_v13, 0.0 }
 0x145   :  { %v752_v43 = vadd.f32 %v751_v42, %v750_v33  ;;  %v759_v62 = vadd.f32 %v758_v48, %v757_v23  ;;  %v791_v46 = vrot.slane %v790_v37, 4  ;;  %v797_v60 = vsel %vm97_vm0, %v1766_v12, 0.0 }
 0x146   :  { %v773_v7 = vadd.f32 %v2088_v29, %v1490_v27  ;;  %v780_v51 = vadd.f32 %v779_v61, %v1588_v55  ;;  %v785_v19 = vadd.f32 %v784_v52, %v783_v39  ;;  %v798_v47 = vrot.slane %v797_v60, 4 }
 0x147   :  { %v804_v1 = vsel %vm97_vm0, %v1769_v4, 0.0  ;;  %v1839_v45 = vadd.f32 %v672_v24, %v671_v63  ;;  %v792_v27 = vadd.f32 %v791_v46, %v790_v37  ;;  %v811_v13 = vsel %vm97_vm0, %v1783_v58, 0.0 }
 0x148   :  { %v805_v36 = vrot.slane %v804_v1, 4  ;;  %v774_v33 = vrot.slane %v773_v7, 1  ;;  %v786_v22 = vrot.slane %v785_v19, 2  ;;  %v799_v23 = vadd.f32 %v798_v47, %v797_v60 }
 0x149   :  { %2089 = vst [vmem:[#allocation32_spill] sm:$0xff] %v1839_v45  ;;  %v812_v8 = vrot.slane %v811_v13, 4  ;;  %v753_v42 = vrot.slane %v752_v43, 1  ;;  %v793_v12 = vrot.slane %v792_v27, 2  ;;  %v2090_v55 = vrot.slane %v1503_v21, 2 }
 0x14a   :  { %v806_v48 = vadd.f32 %v805_v36, %v804_v1  ;;  %v760_v39 = vrot.slane %v759_v62, 1  ;;  %v781_v4 = vrot.slane %v780_v51, 1  ;;  %v800_v63 = vrot.slane %v799_v23, 2 }
 0x14b   :  { %v822_v61 = vadd.f32 %v2090_v55, %v1503_v21  ;;  %v813_v24 = vadd.f32 %v812_v8, %v811_v13  ;;  %v1846_v29 = vadd.f32 %v739_v14, %v738_v38  ;;  %v787_v52 = vadd.f32 %v786_v22, %v785_v19 }
 0x14c   :  { %v794_v37 = vadd.f32 %v793_v12, %v792_v27  ;;  %v2091_v58 = vrot.slane %v1499_v17, 2  ;;  %v1851_v60 = vadd.f32 %v746_v18, %v745_v57  ;;  %v1853_v47 = vadd.f32 %v767_v59, %v766_v32 }
 0x14d   :  { %v807_v1 = vrot.slane %v806_v48, 2  ;;  %v823_v36 = vrot.slane %v822_v61, 1  ;;  %v1855_v45 = vadd.f32 %v624_v34, %v623_v56  ;;  %v1857_v21 = vadd.f32 %v774_v33, %v773_v7 }
 0x14e   :  { %v829_v46 = vadd.f32 %v2091_v58, %v1499_v17  ;;  %v801_v55 = vadd.f32 %v800_v63, %v799_v23  ;;  %v835_v38 = vrot.slane %v1612_v10, 2  ;;  %v1860_v14 = vadd.f32 %v753_v42, %v752_v43 }
 0x14f   :  { %v1862_v19 = vadd.f32 %v760_v39, %v759_v62  ;;  %v1864_v27 = vadd.f32 %v781_v4, %v780_v51  ;;  %v814_v17 = vrot.slane %v813_v24, 2  ;;  %v788_v57 = vrot.slane %v787_v52, 1 }
 0x150   :  { %v795_v18 = vrot.slane %v794_v37, 1  ;;  %v830_v32 = vrot.slane %v829_v46, 1  ;;  %v839_v59 = vsel %vm97_vm0, %v1629_v40, 0.0  ;;  %v808_v56 = vadd.f32 %v807_v1, %v806_v48 }
 0x151   :  { %v1868_v34 = vadd.f32 %v823_v36, %v822_v61  ;;  %v840_v7 = vrot.slane %v839_v59, 4  ;;  %v846_v13 = vsel %vm97_vm0, %v1747_v28, 0.0  ;;  %v802_v43 = vrot.slane %v801_v55, 1 }
 0x152   :  { %v836_v62 = vadd.f32 %v835_v38, %v1612_v10  ;;  %v847_v33 = vrot.slane %v846_v13, 4  ;;  %v853_v51 = vsel %vm97_vm0, %v1772_v25, 0.0  ;;  %v815_v22 = vadd.f32 %v814_v17, %v813_v24 }
 0x153   :  { %v841_v23 = vadd.f32 %v840_v7, %v839_v59  ;;  %v854_v8 = vrot.slane %v853_v51, 4  ;;  %v860_v40 = vsel %vm97_vm0, %v1781_v0, 0.0  ;;  %v867_v48 = vsel %vm97_vm0, %v1822_v9, 0.0 }
 0x154   :  { %v848_v42 = vadd.f32 %v847_v33, %v846_v13  ;;  %v861_v12 = vrot.slane %v860_v40, 4  ;;  %v2092_v28 = vrot.slane %v1566_v2, 2  ;;  %v868_v4 = vrot.slane %v867_v48, 4 }
 0x155   :  { %v842_v10 = vrot.slane %v841_v23, 2  ;;  %v855_v39 = vadd.f32 %v854_v8, %v853_v51  ;;  %v2093_v25 = vrot.slane %v1522_v54, 2  ;;  %v1885_v24 = vadd.f32 %v788_v57, %v787_v52 }
 0x156   :  { %v878_v61 = vadd.f32 %v2092_v28, %v1566_v2  ;;  %v809_v58 = vrot.slane %v808_v56, 1  ;;  %v837_v0 = vrot.slane %v836_v62, 1  ;;  %v862_v1 = vadd.f32 %v861_v12, %v860_v40 }
 0x157   :  { %v885_v63 = vadd.f32 %v2093_v25, %v1522_v54  ;;  %v816_v36 = vrot.slane %v815_v22, 1  ;;  %v849_v38 = vrot.slane %v848_v42, 2  ;;  %v869_v17 = vadd.f32 %v868_v4, %v867_v48 }
 0x158   :  { %v879_v9 = vrot.slane %v878_v61, 1  ;;  %v1887_v59 = vadd.f32 %v830_v32, %v829_v46  ;;  %v843_v7 = vadd.f32 %v842_v10, %v841_v23  ;;  %v856_v2 = vrot.slane %v855_v39, 2 }
 0x159   :  { %v891_v13 = vrot.slane %v1607_v20, 2  ;;  %v1890_v33 = vadd.f32 %v795_v18, %v794_v37  ;;  %v1892_v51 = vadd.f32 %v802_v43, %v801_v55  ;;  %v863_v54 = vrot.slane %v862_v1, 2 }
 0x15a   :  { %v886_v52 = vrot.slane %v885_v63, 1  ;;  %v1894_v57 = vadd.f32 %v809_v58, %v808_v56  ;;  %v1896_v8 = vadd.f32 %v837_v0, %v836_v62  ;;  %v870_v40 = vrot.slane %v869_v17, 2 }
 0x15b   :  { %v895_v12 = vsel %vm97_vm0, %v1626_v26, 0.0  ;;  %v1900_v46 = vadd.f32 %v816_v36, %v815_v22  ;;  %v850_v32 = vadd.f32 %v849_v38, %v848_v42  ;;  %v1902_v23 = vadd.f32 %v879_v9, %v878_v61 }
 0x15c   :  { %v896_v48 = vrot.slane %v895_v12, 4  ;;  %v844_v37 = vrot.slane %v843_v7, 1  ;;  %v857_v18 = vadd.f32 %v856_v2, %v855_v39  ;;  %v892_v55 = vadd.f32 %v891_v13, %v1607_v20 }
 0x15d   :  { %v902_v56 = vsel %vm97_vm0, %v1696_v5, 0.0  ;;  %v864_v43 = vadd.f32 %v863_v54, %v862_v1  ;;  %v1907_v62 = vadd.f32 %v886_v52, %v885_v63  ;;  %v871_v4 = vadd.f32 %v870_v40, %v869_v17 }
 0x15e   :  { %v897_v28 = vadd.f32 %v896_v48, %v895_v12  ;;  %v903_v10 = vrot.slane %v902_v56, 4  ;;  %v909_v26 = vsel %vm97_vm0, %v1786_v44, 0.0  ;;  %v916_v22 = vsel %vm97_vm0, %v1789_v6, 0.0 }
 0x15f   :  { %v923_v42 = vsel %vm97_vm0, %v1814_v50, 0.0  ;;  %v851_v61 = vrot.slane %v850_v32, 1  ;;  %v910_v25 = vrot.slane %v909_v26, 4  ;;  %v858_v5 = vrot.slane %v857_v18, 1 }
 0x160   :  { %v898_v20 = vrot.slane %v897_v28, 2  ;;  %v904_v39 = vadd.f32 %v903_v10, %v902_v56  ;;  %v893_v58 = vrot.slane %v892_v55, 1  ;;  %v917_v63 = vrot.slane %v916_v22, 4 }
 0x161   :  { %v924_v0 = vrot.slane %v923_v42, 4  ;;  %v865_v1 = vrot.slane %v864_v43, 1  ;;  %v911_v17 = vadd.f32 %v910_v25, %v909_v26  ;;  %v872_v9 = vrot.slane %v871_v4, 1  ;;  %v2097_v26 = vld [vmem:[#allocation21_spill] sm:$0xff] }
 0x162   :  { %v899_v36 = vadd.f32 %v898_v20, %v897_v28  ;;  %v905_v38 = vrot.slane %v904_v39, 2  ;;  %v918_v44 = vadd.f32 %v917_v63, %v916_v22  ;;  %1187 = vrcp.f32 %v1738_v16  ;;  %v2096_v28 = vld [vmem:[#allocation17_spill] sm:$0xff]  ;;  %v2099_v22 = vld [vmem:[#allocation8_spill] sm:$0xff] }
 0x163   :  { %v925_v2 = vadd.f32 %v924_v0, %v923_v42  ;;  %v1916_v6 = vadd.f32 %v844_v37, %v843_v7  ;;  %v1918_v50 = vadd.f32 %v851_v61, %v850_v32  ;;  %v912_v13 = vrot.slane %v911_v17, 2  ;;  %v2100_v61 = vld [vmem:[#allocation27_spill] sm:$0xff]  ;;  %v2105_v0 = vld [vmem:[#allocation13_spill] sm:$0xff] }
 0x164   :  { %1189 = vrcp.f32 %v1756_v3  ;;  %v1921_v54 = vadd.f32 %v893_v58, %v892_v55  ;;  %v900_v52 = vrot.slane %v899_v36, 1  ;;  %v919_v40 = vrot.slane %v918_v44, 2  ;;  %v2094_v3 = vld [vmem:[#allocation9_spill] sm:$0xff] }
 0x165   :  { %1191 = vrcp.f32 %v1795_v49  ;;  %v1924_v12 = vadd.f32 %v858_v5, %v857_v18  ;;  %v1926_v48 = vadd.f32 %v905_v38, %v904_v39  ;;  %v926_v56 = vrot.slane %v925_v2, 2  ;;  %v2095_v49 = vld [vmem:[#allocation11_spill] sm:$0xff]  ;;  %v2103_v5 = vld [vmem:[#allocation16_spill] sm:$0xff]  ;;  %v2107_v38 = vld [vmem:[#allocation26_spill] sm:$0xff] }
 0x166   :  { %1193 = vrcp.f32 %v1818_v35  ;;  %v1929_v16 = vadd.f32 %v865_v1, %v864_v43  ;;  %v1931_v7 = vadd.f32 %v872_v9, %v871_v4  ;;  %v1933_v32 = vadd.f32 %v912_v13, %v911_v17  ;;  %v2098_v43 = vld [vmem:[#allocation22_spill] sm:$0xff]  ;;  %v2108_v9 = vld [vmem:[#allocation19_spill] sm:$0xff] }
 0x167   :  { %v931_v37 = vmul.f32 %v2094_v3, %v1804_v41  ;;  %v1937_v55 = vadd.f32 %v919_v40, %v918_v44  ;;  %v933_v18 = vmul.f32 %v2095_v49, %v1809_v31  ;;  %v935_v10 = vmul.f32 %v2096_v28, %v1816_v11  ;;  %v2101_v31 = vld [vmem:[#allocation10_spill] sm:$0xff]  ;;  %v2110_v40 = vld [vmem:[#allocation25_spill] sm:$0xff]  ;;  %v2113_v28 = vld [vmem:[#allocation32_spill] sm:$0xff] }
 0x168   :  { %1195 = vrcp.f32 %v2097_v26  ;;  %v1944_v35 = vadd.f32 %v900_v52, %v899_v36  ;;  %v937_v4 = vmul.f32 %v2098_v43, %v1824_v30  ;;  %v947_v42 = vmul.f32 %v2099_v22, %v1853_v47  ;;  %v2102_v11 = vld [vmem:[#allocation30_spill] sm:$0xff]  ;;  %v2104_v30 = vld [vmem:[#allocation20_spill] sm:$0xff] }
 0x169   :  { %1197 = vrcp.f32 %v2100_v61  ;;  %v907_v41 = vrot.slane %v1926_v48, 1  ;;  %v1952_v20 = vadd.f32 %v926_v56, %v925_v2  ;;  %v949_v39 = vmul.f32 %v2101_v31, %v1857_v21  ;;  %v2106_v36 = vld [vmem:[#allocation12_spill] sm:$0xff]  ;;  %v2111_v56 = vld [vmem:[#allocation29_spill] sm:$0xff] }
 0x16a   :  { %1199 = vrcp.f32 %v2102_v11  ;;  %v914_v25 = vrot.slane %v1933_v32, 1  ;;  %v951_v58 = vmul.f32 %v2103_v5, %v1864_v27  ;;  %v953_v63 = vmul.f32 %v2104_v30, %v1885_v24  ;;  %v2109_v27 = vld [vmem:[#allocation28_spill] sm:$0xff]  ;;  %v2115_v11 = vld [vmem:[#allocation15_spill] sm:$0xff] }
 0x16b   :  { %1201 = vrcp.f32 %v1820_v15  ;;  %v921_v47 = vrot.slane %v1937_v55, 1  ;;  %v963_v1 = vmul.f32 %v2105_v0, %v1868_v34  ;;  %v965_v21 = vmul.f32 %v2106_v36, %v1887_v59 }
 0x16c   :  { %1203 = vrcp.f32 %v2107_v38  ;;  %v1188_v17 = vpop.eup %1187  ;;  %v967_v44 = vmul.f32 %v2108_v9, %v1896_v8  ;;  %v1027_v34 = vsel %vm1026_vm1, %v933_v18, %v931_v37  ;;  %v979_v5 = vmul.f32 %v2115_v11, %v1902_v23 }
 0x16d   :  { %1205 = vrcp.f32 %v2109_v27  ;;  %v939_v15 = vmul.f32 %v1188_v17, %v1846_v29  ;;  %v1029_v13 = vsel %vm1028_vm2, %v935_v10, %v1027_v34  ;;  %v1047_v36 = vsel %vm1026_vm1, %v965_v21, %v963_v1  ;;  %v2117_v17 = vld [vmem:[#allocation18_spill] sm:$0xff] }
 0x16e   :  { %v1190_v24 = vpop.eup %1189  ;;  %1207 = vrcp.f32 %v1807_v53  ;;  %v1031_v29 = vsel %vm1030_vm3, %v937_v4, %v1029_v13  ;;  %v2114_v4 = vld [vmem:[#allocation24_spill] sm:$0xff]  ;;  %v983_v23 = vmul.f32 %v2117_v17, %v1921_v54  ;;  %v1048_v27 = vsel %vm1028_vm2, %v967_v44, %v1047_v36 }
 0x16f   :  { %v1192_v2 = vpop.eup %1191  ;;  %v941_v59 = vmul.f32 %v1190_v24, %v1851_v60  ;;  %1209 = vrcp.f32 %v1855_v45  ;;  %v1033_v3 = vsel %vm1032_vm4, %v939_v15, %v1031_v29  ;;  %v2112_v45 = vld [vmem:[#allocation31_spill] sm:$0xff]  ;;  %v969_v22 = vmul.f32 %v2114_v4, %v1916_v6  ;;  %v2116_v6 = vld [vmem:[#allocation14_spill] sm:$0xff] }
 0x170   :  { %v1194_v8 = vpop.eup %1193  ;;  %v943_v52 = vmul.f32 %v1192_v2, %v1860_v14  ;;  %1211 = vrcp.f32 %v2110_v40  ;;  %v1040_v14 = vsel %vm1026_vm1, %v949_v39, %v947_v42  ;;  %v928_v39 = vrot.slane %v1952_v20, 1  ;;  %v2118_v15 = vld [vmem:[#allocation23_spill] sm:$0xff] }
 0x171   :  { %v945_v53 = vmul.f32 %v1194_v8, %v1862_v19  ;;  %1213 = vrcp.f32 %v2111_v56  ;;  %v1035_v37 = vsel %vm1034_vm5, %v941_v59, %v1033_v3  ;;  %v1041_v10 = vsel %vm1028_vm2, %v951_v58, %v1040_v14 }
 0x172   :  { %v1196_v60 = vpop.eup %1195  ;;  %1215 = vrcp.f32 %v2112_v45  ;;  %v1037_v19 = vsel %vm1036_vm6, %v943_v52, %v1035_v37  ;;  %v1042_v31 = vsel %vm1030_vm3, %v953_v63, %v1041_v10  ;;  %v981_v0 = vmul.f32 %v2116_v6, %v1907_v62 }
 0x173   :  { %v1198_v49 = vpop.eup %1197  ;;  %v955_v18 = vmul.f32 %v1196_v60, %v1890_v33  ;;  %1217 = vrcp.f32 %v2113_v28  ;;  %v1039_v61 = vsel %vm1038_vm7, %v945_v53, %v1037_v19  ;;  %v985_v62 = vmul.f32 %v2118_v15, %v1944_v35 }
 0x174   :  { %v1200_v26 = vpop.eup %1199  ;;  %v957_v43 = vmul.f32 %v1198_v49, %v1892_v51  ;;  %1065 = vst.msk [vmem:[#allocation5] sm:$0xff] %vm97_vm0, %v1039_v61  ;;  %v1049_v1 = vsel %vm1030_vm3, %v969_v22, %v1048_v27  ;;  %v1054_v13 = vsel %vm1026_vm1, %v981_v0, %v979_v5  ;;  %v929_v29 = vadd.f32 %v928_v39, %v1952_v20 }
 0x175   :  { %v1202_v42 = vpop.eup %1201  ;;  %v959_v33 = vmul.f32 %v1200_v26, %v1894_v57  ;;  %v1043_v58 = vsel %vm1032_vm4, %v955_v18, %v1042_v31  ;;  %v1055_v52 = vsel %vm1028_vm2, %v983_v23, %v1054_v13 }
 0x176   :  { %v1204_v51 = vpop.eup %1203  ;;  %v961_v30 = vmul.f32 %v1202_v42, %v1900_v46  ;;  %v1044_v63 = vsel %vm1034_vm5, %v957_v43, %v1043_v58 }
 0x177   :  { %v1206_v38 = vpop.eup %1205  ;;  %v971_v57 = vmul.f32 %v1204_v51, %v1918_v50  ;;  %v1045_v9 = vsel %vm1036_vm6, %v959_v33, %v1044_v63  ;;  %v908_v50 = vadd.f32 %v907_v41, %v1926_v48  ;;  %v922_v48 = vadd.f32 %v921_v47, %v1937_v55 }
 0x178   :  { %v1208_v24 = vpop.eup %1207  ;;  %v973_v46 = vmul.f32 %v1206_v38, %v1924_v12  ;;  %v1046_v34 = vsel %vm1038_vm7, %v961_v30, %v1045_v9  ;;  %v915_v12 = vadd.f32 %v914_v25, %v1933_v32  ;;  %v1056_v25 = vsel %vm1030_vm3, %v985_v62, %v1055_v52 }
 0x179   :  { %v1210_v21 = vpop.eup %1209  ;;  %v975_v54 = vmul.f32 %v1208_v24, %v1929_v16  ;;  %v1050_v2 = vsel %vm1032_vm4, %v971_v57, %v1049_v1  ;;  %1066 = vst.msk [vmem:[#allocation5 + $0x8] sm:$0xff] %vm97_vm0, %v1046_v34 }
 0x17a   :  { %v1212_v44 = vpop.eup %1211  ;;  %v977_v35 = vmul.f32 %v1210_v21, %v1931_v7  ;;  %v1051_v59 = vsel %vm1034_vm5, %v973_v46, %v1050_v2 }
 0x17b   :  { %v1214_v8 = vpop.eup %1213  ;;  %v987_v16 = vmul.f32 %v1212_v44, %v908_v50  ;;  %v1052_v41 = vsel %vm1036_vm6, %v975_v54, %v1051_v59 }
 0x17c   :  { %v1216_v40 = vpop.eup %1215  ;;  %v989_v32 = vmul.f32 %v1214_v8, %v915_v12  ;;  %v1053_v7 = vsel %vm1038_vm7, %v977_v35, %v1052_v41 }
 0x17d   :  { %v1218_v53 = vpop.eup %1217  ;;  %v991_v56 = vmul.f32 %v1216_v40, %v922_v48  ;;  %v1057_v3 = vsel %vm1032_vm4, %v987_v16, %v1056_v25  ;;  %1067 = vst.msk [vmem:[#allocation5 + $0x10] sm:$0xff] %vm97_vm0, %v1053_v7 }
 0x17e   :  { %v993_v55 = vmul.f32 %v1218_v53, %v929_v29  ;;  %v1058_v47 = vsel %vm1034_vm5, %v989_v32, %v1057_v3 }
 0x17f   :  { %v1059_v60 = vsel %vm1036_vm6, %v991_v56, %v1058_v47 }
 0x180   :  { %v1060_v20 = vsel %vm1038_vm7, %v993_v55, %v1059_v60 }
 0x181   :  { %1068 = vst.msk [vmem:[#allocation5 + $0x18] sm:$0xff] %vm97_vm0, %v1060_v20 }
 0x182   :  { %1267 = shalt.err (!%p1264_p12)
}
 0x183   :  { %s1268_s28 = scalar_lea.hbm %s2060_s2, 512 }
 0x184   :  { %p1269_p13 = scmp.ne.s32.totalorder %s2060_s2, %s1268_s28  ;;  %p1272_p0 = scmp.lt.u32.totalorder %s1268_s28, %s2060_s2 }
 0x186   :  { %p1274_p1 = pnand %p1272_p0, %p1269_p13 }
 0x188   :  { %1277 = shalt.err (!%p1274_p1)
}
 0x189   :  { %1080 = dma.vmem_to_hbm [thread:$0]  %s1075_s1, 512, %s2060_s2, [#allocation4], %s1283_s19, %s1283_s19, %s1284_s20  }
 0x18a   :  { %1280 = dma.done.wait [#allocation4], 512  }
 0x18b   :  { %1281 = vsyncadd [#allocation4], 4294966784 }
 0x18c   :  { %1084 = vsyncpa [#allocation3], 1 }
 0x18d   :  { %1085 = vsyncpa [#allocation4], 1 }

</bundles_post_ra>
